<compile_context>
chip_gen: v7x
topology: tpu7x:2x2x1
jax: 0.10.0
libtpu: 0.0.40
codegen_flags: <defaults>
</compile_context>

<pallas_src>
import functools

import jax
import jax.numpy as jnp
from jax.experimental import pallas as pl
from jax.experimental.pallas import tpu as pltpu

EPS_RMS = 1e-6   # SimpleRMSNorm eps (bitnet uses F.normalize; value assumed)
EPS_LN = 1e-5    # nn.LayerNorm default eps
NEG_INF = -1e30


# ----------------------- wrapper-side weight quantization --------------------

def _ternary_quant(w):
    """absmean ternary quant -> (integer-valued {-1,0,1} matrix, dequant scale)."""
    ws = 1.0 / jnp.maximum(jnp.mean(jnp.abs(w)), 1e-5)
    w_int = jnp.clip(jnp.round(w * ws), -1.0, 1.0)
    return w_int, 1.0 / ws


# ------------------------------ in-kernel helpers ------------------------------

def _rms_int8(x):
    """SimpleRMSNorm + per-token absmax int8 quant.

    Returns (integer-valued f32 activations in [-128, 127], per-row dequant factor).
    """
    xn = x * jax.lax.rsqrt(jnp.mean(x * x, axis=-1, keepdims=True) + EPS_RMS)
    absmax = jnp.maximum(jnp.max(jnp.abs(xn), axis=-1, keepdims=True), 1e-5)
    x_int = jnp.clip(jnp.round(xn * (127.0 / absmax)), -128.0, 127.0)
    return x_int, absmax * (1.0 / 127.0)


def _bit_dot(x_int, w_ref, use_int8):
    """Quantized projection matmul.

    int8 x int8 -> int32 on chips with an integer MXU (v4/v5e/v6e),
    bf16 x bf16 -> f32 otherwise (v7x).  Both are exact: activations are
    integers in [-128,127], weights are small-integer ternary (or group sums).
    """
    if use_int8:
        acc = jnp.dot(x_int.astype(jnp.int8), w_ref[...],
                      preferred_element_type=jnp.int32)
        return acc.astype(jnp.float32)
    return jnp.dot(x_int.astype(jnp.bfloat16), w_ref[...],
                   preferred_element_type=jnp.float32)


# ---------------------------------- kernel ------------------------------------

def bit_mgqa_flash_kernel(xq_ref, xkv_ref, wq_ref, wk_ref, wv_ref, wo_ref,
                          ln_ref, scales_ref, o_ref,
                          q_sc, m_sc, l_sc, acc_sc,
                          *, kv_heads, head_dim, tq, tk, is_causal, use_int8):
    d = head_dim
    qi = pl.program_id(1)
    ki = pl.program_id(2)
    n_kv = pl.num_programs(2)

    # per-matrix weight dequant scales (SMEM scalars)
    s_q = scales_ref[0]
    s_k = scales_ref[1]
    s_o = scales_ref[3]
    # scales_ref[2] (s_v) intentionally unused: a global positive scalar on v is
    # a no-op through the downstream LayerNorm.

    @pl.when(ki == 0)
    def _init():
        x = xq_ref[0].astype(jnp.float32)                         # (tq, E)
        x_int, inv_a = _rms_int8(x)
        # W_q already has the query-group sum folded in; both 1/sqrt(d) scalings
        # of the reference are folded into a single 1/d factor on q.
        q = _bit_dot(x_int, wq_ref, use_int8) * (inv_a * (s_q * (1.0 / float(d))))
        for h in range(kv_heads):
            q_sc[h] = q[:, h * d:(h + 1) * d]
        m_sc[...] = jnp.full(m_sc.shape, -jnp.inf, jnp.float32)
        l_sc[...] = jnp.zeros(l_sc.shape, jnp.float32)
        acc_sc[...] = jnp.zeros(acc_sc.shape, jnp.float32)

    def _process_kv_tile():
        xkv = xkv_ref[0].astype(jnp.float32)                      # (tk, E)
        x_int, inv_kv = _rms_int8(xkv)
        k = _bit_dot(x_int, wk_ref, use_int8) * (inv_kv * s_k)    # (tk, kv_dim)
        v = _bit_dot(x_int, wv_ref, use_int8) * inv_kv            # (tk, kv_dim)

        if is_causal:
            row_g = qi * tq + jax.lax.broadcasted_iota(jnp.int32, (tq, tk), 0)
            col_g = ki * tk + jax.lax.broadcasted_iota(jnp.int32, (tq, tk), 1)
            keep = col_g <= row_g

        # Per-kv-head online-softmax update.  Short static unroll; only static
        # lane slices of VALUES are taken (no d-minor reshape/transpose relayouts).
        for h in range(kv_heads):
            sl = slice(h * d, (h + 1) * d)
            q_h = q_sc[h].astype(jnp.bfloat16)                    # (tq, d)
            k_h = k[:, sl].astype(jnp.bfloat16)                   # (tk, d)
            v_h = v[:, sl].astype(jnp.bfloat16)
            s = jax.lax.dot_general(q_h, k_h, (((1,), (1,)), ((), ())),
                                    preferred_element_type=jnp.float32)  # (tq, tk)
            if is_causal:
                s = jnp.where(keep, s, NEG_INF)
            m_prev = m_sc[h]                                      # (tq, 1)
            m_new = jnp.maximum(m_prev, jnp.max(s, axis=-1, keepdims=True))
            alpha = jnp.exp(m_prev - m_new)
            p = jnp.exp(s - m_new)
            l_sc[h] = alpha * l_sc[h] + jnp.sum(p, axis=-1, keepdims=True)
            acc_sc[h] = alpha * acc_sc[h] + jnp.dot(
                p.astype(jnp.bfloat16), v_h, preferred_element_type=jnp.float32)
            m_sc[h] = m_new

    if is_causal:
        # skip kv tiles that lie entirely above the diagonal (fully masked)
        pl.when((ki * tk) <= (qi * tq + (tq - 1)))(_process_kv_tile)
    else:
        _process_kv_tile()

    @pl.when(ki == n_kv - 1)
    def _finalize():
        outs = [acc_sc[h] * pl.reciprocal(l_sc[h], approx=True)
                for h in range(kv_heads)]
        out = outs[0] if kv_heads == 1 else jnp.concatenate(outs, axis=-1)  # (tq, kv_dim)

        # MAGNETO-style LayerNorm over kv_dim (f32)
        mu = jnp.mean(out, axis=-1, keepdims=True)
        var = jnp.mean((out - mu) ** 2, axis=-1, keepdims=True)
        out = (out - mu) * jax.lax.rsqrt(var + EPS_LN)
        ln = ln_ref[...]                                          # (2, kv_dim)
        out = out * ln[0:1, :] + ln[1:2, :]

        # BitLinear output projection
        o_int, inv_o = _rms_int8(out)
        y = _bit_dot(o_int, wo_ref, use_int8)
        o_ref[0] = (y * (inv_o * s_o)).astype(o_ref.dtype)        # (tq, E)


# --------------------------------- wrapper -------------------------------------

def _device_info():
    """(has integer MXU?, per-generation VMEM limit in bytes)."""
    kind = ""
    try:
        kind = jax.devices()[0].device_kind.lower()
    except Exception:
        pass
    has_int8_mxu = ("v7" not in kind) and ("7x" not in kind)   # v7x MXU is bf16/fp8 only
    try:
        vmem_phys = int(pltpu.get_tpu_info().vmem_capacity_bytes)
    except Exception:
        vmem_phys = None
    if vmem_phys is None:
        vmem_limit = 48 * 1024 * 1024                 # safe on every generation
    else:
        # ~75% of physical: 96 MiB on v5e/v6e (128 MiB), 48 MiB on v7x (64 MiB)
        vmem_limit = min(96 * 1024 * 1024, (vmem_phys * 3) // 4)
    return has_int8_mxu, vmem_limit


def _pick_tile(n, cap):
    if n <= cap:
        return n
    t = (cap // 8) * 8
    while t > 8 and n % t != 0:
        t -= 8
    return max(t, 8)


def self_attention_forward(x, params, *, n_heads=4, is_causal=False,
                           tq_cap=256, tk_cap=512):
    B, N, E = x.shape
    assert n_heads % 2 == 0 and E % n_heads == 0
    kv_heads = n_heads // 2
    g = n_heads // kv_heads
    d = E // n_heads
    kv_dim = kv_heads * d
    wq, wk, wv, ln_g, ln_b, wo = params

    # --- hoisted absmean ternary weight quantization (once per call) ---
    wq_i, s_q = _ternary_quant(wq)                 # (E, n_heads*d)
    wk_i, s_k = _ternary_quant(wk)
    wv_i, s_v = _ternary_quant(wv)
    wo_i, s_o = _ternary_quant(wo)

    # fold the grouped-query head summation into W_q: sum_g (x W_g) == x (sum_g W_g)
    # einops "(h g)" ordering: head index = h*g + gi  ->  (E, kv_heads, g, d)
    wq_i = wq_i.reshape(E, kv_heads, g, d).sum(axis=2).reshape(E, kv_dim)

    scales = jnp.stack([s_q, s_k, s_v, s_o]).astype(jnp.float32)      # (4,) -> SMEM
    ln_gb = jnp.concatenate([ln_g.reshape(1, kv_dim),
                             ln_b.reshape(1, kv_dim)], axis=0)        # (2, kv_dim)

    tq = _pick_tile(N, tq_cap)
    tk = _pick_tile(N, tk_cap)
    assert N % tq == 0 and N % tk == 0, "sequence length must tile evenly"
    nq, nk = N // tq, N // tk

    has_int8_mxu, vmem_limit = _device_info()

    def build_and_run(use_int8, single_buffer_weights, vmem_bytes):
        wdt = jnp.int8 if use_int8 else jnp.bfloat16   # small-integer weights: exact either way
        wq_b = wq_i.astype(wdt)
        wk_b = wk_i.astype(wdt)
        wv_b = wv_i.astype(wdt)
        wo_b = wo_i.astype(wdt)

        # constant-index weights / LN params: single-buffer them (never re-fetched)
        const_kw = {"pipeline_mode": pl.Buffered(1)} if single_buffer_weights else {}

        kernel = functools.partial(
            bit_mgqa_flash_kernel, kv_heads=kv_heads, head_dim=d,
            tq=tq, tk=tk, is_causal=is_causal, use_int8=use_int8)

        out = pl.pallas_call(
            kernel,
            out_shape=jax.ShapeDtypeStruct((B, N, E), x.dtype),
            grid_spec=pltpu.PrefetchScalarGridSpec(
                num_scalar_prefetch=0,
                grid=(B, nq, nk),                       # kv sweep innermost ("arbitrary")
                in_specs=[
                    pl.BlockSpec((1, tq, E), lambda b, i, j: (b, i, 0)),       # x (query tile)
                    pl.BlockSpec((1, tk, E), lambda b, i, j: (b, j, 0)),       # x (kv tile)
                    pl.BlockSpec((E, kv_dim), lambda b, i, j: (0, 0), **const_kw),  # W_q (group-summed)
                    pl.BlockSpec((E, kv_dim), lambda b, i, j: (0, 0), **const_kw),  # W_k
                    pl.BlockSpec((E, kv_dim), lambda b, i, j: (0, 0), **const_kw),  # W_v
                    pl.BlockSpec((kv_dim, E), lambda b, i, j: (0, 0), **const_kw),  # W_out
                    pl.BlockSpec((2, kv_dim), lambda b, i, j: (0, 0), **const_kw),  # LN gamma/beta
                    pl.BlockSpec(memory_space=pltpu.MemorySpace.SMEM),              # weight scales
                ],
                out_specs=pl.BlockSpec((1, tq, E), lambda b, i, j: (b, i, 0)),
                scratch_shapes=[
                    pltpu.VMEM((kv_heads, tq, d), jnp.float32),   # q (pre-scaled)
                    pltpu.VMEM((kv_heads, tq, 1), jnp.float32),   # running max m
                    pltpu.VMEM((kv_heads, tq, 1), jnp.float32),   # running sum l
                    pltpu.VMEM((kv_heads, tq, d), jnp.float32),   # output accumulator
                ]),
            compiler_params=pltpu.CompilerParams(
                dimension_semantics=("parallel", "parallel", "arbitrary"),
                vmem_limit_bytes=vmem_bytes),
        )(x, x, wq_b, wk_b, wv_b, wo_b, ln_gb, scales)
        return jax.block_until_ready(out)

    try:
        return build_and_run(use_int8=has_int8_mxu,
                             single_buffer_weights=True,
                             vmem_bytes=vmem_limit)
    except Exception:
        # conservative fallback: bf16 MXU path, default buffering, default VMEM limit
        return build_and_run(use_int8=False, single_buffer_weights=False,
                             vmem_bytes=None)


# ----------------------------- pure-JAX reference -------------------------------

def self_attention_reference(x, params, *, n_heads=4, is_causal=False):
    wq, wk, wv, ln_g, ln_b, wo = params
    B, N, E = x.shape
    kv_heads = n_heads // 2
    d = E // n_heads
    g = n_heads // kv_heads

    def bitlinear(t, w):
        tn = t * jax.lax.rsqrt(jnp.mean(t * t, axis=-1, keepdims=True) + EPS_RMS)
        s = 127.0 / jnp.maximum(jnp.max(jnp.abs(tn), axis=-1, keepdims=True), 1e-5)
        tq = jnp.clip(jnp.round(tn * s), -128.0, 127.0) / s
        ws = 1.0 / jnp.maximum(jnp.mean(jnp.abs(w)), 1e-5)
        wz = jnp.clip(jnp.round(w * ws), -1.0, 1.0) / ws
        return tq @ wz

    q = bitlinear(x, wq); k = bitlinear(x, wk); v = bitlinear(x, wv)
    scale = float(d) ** 0.5
    q = q / scale
    qh = q.reshape(B, N, n_heads, d).transpose(0, 2, 1, 3)     # (B, hq, N, d)
    kh = k.reshape(B, N, kv_heads, d).transpose(0, 2, 1, 3)    # (B, hk, S, d)
    vh = v.reshape(B, N, kv_heads, d).transpose(0, 2, 1, 3)
    qg = qh.reshape(B, kv_heads, g, N, d)                      # "(h g)" split
    sim = jnp.einsum('bhgnd,bhsd->bhns', qg, kh)               # sums over g
    if is_causal:
        mask = jnp.tril(jnp.ones((N, N), bool))
        sim = jnp.where(mask[None, None], sim, jnp.finfo(jnp.float32).min)
    attn = jax.nn.softmax(sim / scale, axis=-1)
    out = jnp.einsum('bhns,bhsd->bhnd', attn, vh)
    out = out.transpose(0, 2, 1, 3).reshape(B, N, kv_heads * d)
    mu = out.mean(-1, keepdims=True)
    var = ((out - mu) ** 2).mean(-1, keepdims=True)
    out = (out - mu) * jax.lax.rsqrt(var + EPS_LN) * ln_g.reshape(-1) + ln_b.reshape(-1)
    return bitlinear(out, wo)


# ------------------------------------ main --------------------------------------

if __name__ == "__main__":
    B, N, E, H = 2, 8, 32, 4            # batch, seq, embed_dim, n_heads
    KV = (E // H) * (H // 2)            # kv_embed_dim

    key = jax.random.PRNGKey(0)
    kx, kq, kk, kv_, ko = jax.random.split(key, 5)
    x = jax.random.normal(kx, (B, N, E), jnp.float32)
    wq = jax.random.normal(kq, (E, E), jnp.float32) * 0.05
    wk = jax.random.normal(kk, (E, KV), jnp.float32) * 0.05
    wv = jax.random.normal(kv_, (E, KV), jnp.float32) * 0.05
    wo = jax.random.normal(ko, (KV, E), jnp.float32) * 0.05
    ln_g = jnp.ones((1, KV), jnp.float32)     # LayerNorm init: gamma=1, beta=0
    ln_b = jnp.zeros((1, KV), jnp.float32)
    params = (wq, wk, wv, ln_g, ln_b, wo)

    for causal in (False, True):
        out = self_attention_forward(x, params, n_heads=H, is_causal=causal)
        out = jax.block_until_ready(out)
        ref = self_attention_reference(x, params, n_heads=H, is_causal=causal)
        assert out.shape == (B, N, E)
        assert bool(jnp.all(jnp.isfinite(out)))
        err = float(jnp.max(jnp.abs(out - ref)))
        assert bool(jnp.allclose(out, ref, atol=2e-2, rtol=2e-2)), \
            f"mismatch (causal={causal}): {err}"

    print("KERNEL_OK")
</pallas_src>

<mosaic_0001>
module attributes {stable_mosaic.version = 11 : i64} {
  func.func @bit_mgqa_flash_kernel(%arg0: i32, %arg1: i32, %arg2: i32, %arg3: memref<1x8x32xf32, #tpu.memory_space<vmem>>, %arg4: memref<1x8x32xf32, #tpu.memory_space<vmem>>, %arg5: memref<32x16xi8, #tpu.memory_space<vmem>>, %arg6: memref<32x16xi8, #tpu.memory_space<vmem>>, %arg7: memref<32x16xi8, #tpu.memory_space<vmem>>, %arg8: memref<16x32xi8, #tpu.memory_space<vmem>>, %arg9: memref<2x16xf32, #tpu.memory_space<vmem>>, %arg10: memref<4xf32, #tpu.memory_space<smem>>, %arg11: memref<1x8x32xf32, #tpu.memory_space<vmem>>, %arg12: memref<2x8x8xf32, #tpu.memory_space<vmem>>, %arg13: memref<2x8x1xf32, #tpu.memory_space<vmem>>, %arg14: memref<2x8x1xf32, #tpu.memory_space<vmem>>, %arg15: memref<2x8x8xf32, #tpu.memory_space<vmem>>) attributes {dimension_semantics = [#tpu.dimension_semantics<parallel>, #tpu.dimension_semantics<parallel>, #tpu.dimension_semantics<arbitrary>], iteration_bounds = array<i64: 2, 1, 1>, scalar_prefetch = 0 : i64, scratch_operands = 4 : i64, tpu.core_type = #tpu.core_type<tc>, window_params = [{transform_indices = @transform_0, window_bounds = array<i64: 1, 8, 32>}, {transform_indices = @transform_1, window_bounds = array<i64: 1, 8, 32>}, {pipeline_mode = #tpu.pipeline_mode<synchronous>, transform_indices = @transform_2, window_bounds = array<i64: 32, 16>}, {pipeline_mode = #tpu.pipeline_mode<synchronous>, transform_indices = @transform_3, window_bounds = array<i64: 32, 16>}, {pipeline_mode = #tpu.pipeline_mode<synchronous>, transform_indices = @transform_4, window_bounds = array<i64: 32, 16>}, {pipeline_mode = #tpu.pipeline_mode<synchronous>, transform_indices = @transform_5, window_bounds = array<i64: 16, 32>}, {pipeline_mode = #tpu.pipeline_mode<synchronous>, transform_indices = @transform_6, window_bounds = array<i64: 2, 16>}, {transform_indices = @transform_7, window_bounds = array<i64: 4>}, {transform_indices = @transform_8, window_bounds = array<i64: 1, 8, 32>}]} {
    %c0 = arith.constant 0 : index
    %0 = memref.load %arg10[%c0] : memref<4xf32, #tpu.memory_space<smem>>
    %c1 = arith.constant 1 : index
    %1 = memref.load %arg10[%c1] : memref<4xf32, #tpu.memory_space<smem>>
    %c3 = arith.constant 3 : index
    %2 = memref.load %arg10[%c3] : memref<4xf32, #tpu.memory_space<smem>>
    %c0_i32 = arith.constant 0 : i32
    %3 = arith.cmpi eq, %arg2, %c0_i32 : i32
    %4 = arith.extui %3 : i1 to i32
    %c0_i32_0 = arith.constant 0 : i32
    %5 = arith.cmpi ne, %4, %c0_i32_0 : i32
    scf.if %5 {
      %c0_70 = arith.constant 0 : index
      %c0_71 = arith.constant 0 : index
      %c0_72 = arith.constant 0 : index
      %131 = vector.load %arg3[%c0_70, %c0_71, %c0_72] : memref<1x8x32xf32, #tpu.memory_space<vmem>>, vector<1x8x32xf32>
      %132 = vector.shape_cast %131 : vector<1x8x32xf32> to vector<8x32xf32>
      %133 = arith.mulf %132, %132 : vector<8x32xf32>
      %cst_73 = arith.constant dense<0.000000e+00> : vector<8xf32>
      %134 = vector.multi_reduction <add>, %133, %cst_73 [1] : vector<8x32xf32> to vector<8xf32>
      %135 = vector.shape_cast %134 : vector<8xf32> to vector<8x1xf32>
      %cst_74 = arith.constant 3.200000e+01 : f32
      %136 = vector.broadcast %cst_74 : f32 to vector<8x1xf32>
      %137 = arith.divf %135, %136 : vector<8x1xf32>
      %cst_75 = arith.constant 9.99999997E-7 : f32
      %138 = vector.broadcast %cst_75 : f32 to vector<8x1xf32>
      %139 = arith.addf %137, %138 : vector<8x1xf32>
      %140 = math.rsqrt %139 : vector<8x1xf32>
      %141 = vector.broadcast %140 : vector<8x1xf32> to vector<8x32xf32>
      %142 = arith.mulf %132, %141 : vector<8x32xf32>
      %143 = math.absf %142 : vector<8x32xf32>
      %cst_76 = arith.constant dense<0xFF800000> : vector<8xf32>
      %144 = vector.multi_reduction <maximumf>, %143, %cst_76 [1] : vector<8x32xf32> to vector<8xf32>
      %145 = vector.shape_cast %144 : vector<8xf32> to vector<8x1xf32>
      %cst_77 = arith.constant 9.99999974E-6 : f32
      %146 = vector.broadcast %cst_77 : f32 to vector<8x1xf32>
      %147 = arith.maximumf %145, %146 : vector<8x1xf32>
      %cst_78 = arith.constant 1.270000e+02 : f32
      %148 = vector.broadcast %cst_78 : f32 to vector<8x1xf32>
      %149 = arith.divf %148, %147 : vector<8x1xf32>
      %150 = vector.broadcast %149 : vector<8x1xf32> to vector<8x32xf32>
      %151 = arith.mulf %142, %150 : vector<8x32xf32>
      %152 = math.roundeven %151 : vector<8x32xf32>
      %cst_79 = arith.constant -1.280000e+02 : f32
      %cst_80 = arith.constant 1.270000e+02 : f32
      %153 = vector.broadcast %cst_79 : f32 to vector<8x32xf32>
      %154 = arith.maximumf %153, %152 : vector<8x32xf32>
      %155 = vector.broadcast %cst_80 : f32 to vector<8x32xf32>
      %156 = arith.minimumf %155, %154 : vector<8x32xf32>
      %cst_81 = arith.constant 0.00787401571 : f32
      %157 = vector.broadcast %cst_81 : f32 to vector<8x1xf32>
      %158 = arith.mulf %147, %157 : vector<8x1xf32>
      %159 = arith.fptosi %156 : vector<8x32xf32> to vector<8x32xi8>
      %c0_82 = arith.constant 0 : index
      %c0_83 = arith.constant 0 : index
      %160 = vector.load %arg5[%c0_82, %c0_83] : memref<32x16xi8, #tpu.memory_space<vmem>>, vector<32x16xi8>
      %cst_84 = arith.constant dense<0> : vector<8x16xi32>
      %161 = tpu.matmul %159, %160, %cst_84 {dimension_numbers = #tpu.dot_dimension_numbers<[1], [0], [0], [1], [0, 0, 1, 1], [], []>} : vector<8x32xi8>, vector<32x16xi8>, vector<8x16xi32> -> vector<8x16xi32>
      %162 = arith.sitofp %161 : vector<8x16xi32> to vector<8x16xf32>
      %cst_85 = arith.constant 1.250000e-01 : f32
      %163 = arith.mulf %0, %cst_85 : f32
      %164 = vector.broadcast %163 : f32 to vector<8x1xf32>
      %165 = arith.mulf %158, %164 : vector<8x1xf32>
      %166 = vector.broadcast %165 : vector<8x1xf32> to vector<8x16xf32>
      %167 = arith.mulf %162, %166 : vector<8x16xf32>
      %168 = vector.extract_strided_slice %167 {offsets = [0, 0], sizes = [8, 8], strides = [1, 1]} : vector<8x16xf32> to vector<8x8xf32>
      %c0_86 = arith.constant 0 : index
      %c0_87 = arith.constant 0 : index
      %c0_88 = arith.constant 0 : index
      %169 = vector.load %arg12[%c0_86, %c0_87, %c0_88] : memref<2x8x8xf32, #tpu.memory_space<vmem>>, vector<1x8x8xf32>
      %170 = vector.shape_cast %169 : vector<1x8x8xf32> to vector<8x8xf32>
      %171 = vector.shape_cast %168 : vector<8x8xf32> to vector<1x8x8xf32>
      tpu.vector_store %arg12[%c0_86, %c0_87, %c0_88], %171 {strides = array<i32>} : memref<2x8x8xf32, #tpu.memory_space<vmem>>, vector<1x8x8xf32>,
      %172 = vector.extract_strided_slice %167 {offsets = [0, 8], sizes = [8, 8], strides = [1, 1]} : vector<8x16xf32> to vector<8x8xf32>
      %c1_89 = arith.constant 1 : index
      %c0_90 = arith.constant 0 : index
      %c0_91 = arith.constant 0 : index
      %173 = vector.load %arg12[%c1_89, %c0_90, %c0_91] : memref<2x8x8xf32, #tpu.memory_space<vmem>>, vector<1x8x8xf32>
      %174 = vector.shape_cast %173 : vector<1x8x8xf32> to vector<8x8xf32>
      %175 = vector.shape_cast %172 : vector<8x8xf32> to vector<1x8x8xf32>
      tpu.vector_store %arg12[%c1_89, %c0_90, %c0_91], %175 {strides = array<i32>} : memref<2x8x8xf32, #tpu.memory_space<vmem>>, vector<1x8x8xf32>,
      %cst_92 = arith.constant 0xFF800000 : f32
      %176 = vector.broadcast %cst_92 : f32 to vector<2x8x1xf32>
      %c0_93 = arith.constant 0 : index
      %c0_94 = arith.constant 0 : index
      %c0_95 = arith.constant 0 : index
      %177 = vector.load %arg13[%c0_93, %c0_94, %c0_95] : memref<2x8x1xf32, #tpu.memory_space<vmem>>, vector<2x8x1xf32>
      tpu.vector_store %arg13[%c0_93, %c0_94, %c0_95], %176 {strides = array<i32>} : memref<2x8x1xf32, #tpu.memory_space<vmem>>, vector<2x8x1xf32>,
      %cst_96 = arith.constant 0.000000e+00 : f32
      %178 = vector.broadcast %cst_96 : f32 to vector<2x8x1xf32>
      %c0_97 = arith.constant 0 : index
      %c0_98 = arith.constant 0 : index
      %c0_99 = arith.constant 0 : index
      %179 = vector.load %arg14[%c0_97, %c0_98, %c0_99] : memref<2x8x1xf32, #tpu.memory_space<vmem>>, vector<2x8x1xf32>
      tpu.vector_store %arg14[%c0_97, %c0_98, %c0_99], %178 {strides = array<i32>} : memref<2x8x1xf32, #tpu.memory_space<vmem>>, vector<2x8x1xf32>,
      %cst_100 = arith.constant 0.000000e+00 : f32
      %180 = vector.broadcast %cst_100 : f32 to vector<2x8x8xf32>
      %c0_101 = arith.constant 0 : index
      %c0_102 = arith.constant 0 : index
      %c0_103 = arith.constant 0 : index
      %181 = vector.load %arg15[%c0_101, %c0_102, %c0_103] : memref<2x8x8xf32, #tpu.memory_space<vmem>>, vector<2x8x8xf32>
      tpu.vector_store %arg15[%c0_101, %c0_102, %c0_103], %180 {strides = array<i32>} : memref<2x8x8xf32, #tpu.memory_space<vmem>>, vector<2x8x8xf32>,
    } else {
    }
    %c0_1 = arith.constant 0 : index
    %c0_2 = arith.constant 0 : index
    %c0_3 = arith.constant 0 : index
    %6 = vector.load %arg4[%c0_1, %c0_2, %c0_3] : memref<1x8x32xf32, #tpu.memory_space<vmem>>, vector<1x8x32xf32>
    %7 = vector.shape_cast %6 : vector<1x8x32xf32> to vector<8x32xf32>
    %8 = arith.mulf %7, %7 : vector<8x32xf32>
    %cst = arith.constant dense<0.000000e+00> : vector<8xf32>
    %9 = vector.multi_reduction <add>, %8, %cst [1] : vector<8x32xf32> to vector<8xf32>
    %10 = vector.shape_cast %9 : vector<8xf32> to vector<8x1xf32>
    %cst_4 = arith.constant 3.200000e+01 : f32
    %11 = vector.broadcast %cst_4 : f32 to vector<8x1xf32>
    %12 = arith.divf %10, %11 : vector<8x1xf32>
    %cst_5 = arith.constant 9.99999997E-7 : f32
    %13 = vector.broadcast %cst_5 : f32 to vector<8x1xf32>
    %14 = arith.addf %12, %13 : vector<8x1xf32>
    %15 = math.rsqrt %14 : vector<8x1xf32>
    %16 = vector.broadcast %15 : vector<8x1xf32> to vector<8x32xf32>
    %17 = arith.mulf %7, %16 : vector<8x32xf32>
    %18 = math.absf %17 : vector<8x32xf32>
    %cst_6 = arith.constant dense<0xFF800000> : vector<8xf32>
    %19 = vector.multi_reduction <maximumf>, %18, %cst_6 [1] : vector<8x32xf32> to vector<8xf32>
    %20 = vector.shape_cast %19 : vector<8xf32> to vector<8x1xf32>
    %cst_7 = arith.constant 9.99999974E-6 : f32
    %21 = vector.broadcast %cst_7 : f32 to vector<8x1xf32>
    %22 = arith.maximumf %20, %21 : vector<8x1xf32>
    %cst_8 = arith.constant 1.270000e+02 : f32
    %23 = vector.broadcast %cst_8 : f32 to vector<8x1xf32>
    %24 = arith.divf %23, %22 : vector<8x1xf32>
    %25 = vector.broadcast %24 : vector<8x1xf32> to vector<8x32xf32>
    %26 = arith.mulf %17, %25 : vector<8x32xf32>
    %27 = math.roundeven %26 : vector<8x32xf32>
    %cst_9 = arith.constant -1.280000e+02 : f32
    %cst_10 = arith.constant 1.270000e+02 : f32
    %28 = vector.broadcast %cst_9 : f32 to vector<8x32xf32>
    %29 = arith.maximumf %28, %27 : vector<8x32xf32>
    %30 = vector.broadcast %cst_10 : f32 to vector<8x32xf32>
    %31 = arith.minimumf %30, %29 : vector<8x32xf32>
    %cst_11 = arith.constant 0.00787401571 : f32
    %32 = vector.broadcast %cst_11 : f32 to vector<8x1xf32>
    %33 = arith.mulf %22, %32 : vector<8x1xf32>
    %34 = arith.fptosi %31 : vector<8x32xf32> to vector<8x32xi8>
    %c0_12 = arith.constant 0 : index
    %c0_13 = arith.constant 0 : index
    %35 = vector.load %arg6[%c0_12, %c0_13] : memref<32x16xi8, #tpu.memory_space<vmem>>, vector<32x16xi8>
    %cst_14 = arith.constant dense<0> : vector<8x16xi32>
    %36 = tpu.matmul %34, %35, %cst_14 {dimension_numbers = #tpu.dot_dimension_numbers<[1], [0], [0], [1], [0, 0, 1, 1], [], []>} : vector<8x32xi8>, vector<32x16xi8>, vector<8x16xi32> -> vector<8x16xi32>
    %37 = arith.sitofp %36 : vector<8x16xi32> to vector<8x16xf32>
    %38 = vector.broadcast %1 : f32 to vector<8x1xf32>
    %39 = arith.mulf %33, %38 : vector<8x1xf32>
    %40 = vector.broadcast %39 : vector<8x1xf32> to vector<8x16xf32>
    %41 = arith.mulf %37, %40 : vector<8x16xf32>
    %42 = arith.fptosi %31 : vector<8x32xf32> to vector<8x32xi8>
    %c0_15 = arith.constant 0 : index
    %c0_16 = arith.constant 0 : index
    %43 = vector.load %arg7[%c0_15, %c0_16] : memref<32x16xi8, #tpu.memory_space<vmem>>, vector<32x16xi8>
    %cst_17 = arith.constant dense<0> : vector<8x16xi32>
    %44 = tpu.matmul %42, %43, %cst_17 {dimension_numbers = #tpu.dot_dimension_numbers<[1], [0], [0], [1], [0, 0, 1, 1], [], []>} : vector<8x32xi8>, vector<32x16xi8>, vector<8x16xi32> -> vector<8x16xi32>
    %45 = arith.sitofp %44 : vector<8x16xi32> to vector<8x16xf32>
    %46 = vector.broadcast %33 : vector<8x1xf32> to vector<8x16xf32>
    %47 = arith.mulf %45, %46 : vector<8x16xf32>
    %c0_18 = arith.constant 0 : index
    %c0_19 = arith.constant 0 : index
    %c0_20 = arith.constant 0 : index
    %48 = vector.load %arg12[%c0_18, %c0_19, %c0_20] : memref<2x8x8xf32, #tpu.memory_space<vmem>>, vector<1x8x8xf32>
    %49 = vector.shape_cast %48 : vector<1x8x8xf32> to vector<8x8xf32>
    %50 = arith.truncf %49 : vector<8x8xf32> to vector<8x8xbf16>
    %51 = vector.extract_strided_slice %41 {offsets = [0, 0], sizes = [8, 8], strides = [1, 1]} : vector<8x16xf32> to vector<8x8xf32>
    %52 = arith.truncf %51 : vector<8x8xf32> to vector<8x8xbf16>
    %53 = vector.extract_strided_slice %47 {offsets = [0, 0], sizes = [8, 8], strides = [1, 1]} : vector<8x16xf32> to vector<8x8xf32>
    %54 = arith.truncf %53 : vector<8x8xf32> to vector<8x8xbf16>
    %cst_21 = arith.constant dense<0.000000e+00> : vector<8x8xf32>
    %55 = tpu.matmul %50, %52, %cst_21 {dimension_numbers = #tpu.dot_dimension_numbers<[1], [1], [0], [0], [0, 0, 1, 0], [], []>} : vector<8x8xbf16>, vector<8x8xbf16>, vector<8x8xf32> -> vector<8x8xf32>
    %c0_22 = arith.constant 0 : index
    %c0_23 = arith.constant 0 : index
    %c0_24 = arith.constant 0 : index
    %56 = vector.load %arg13[%c0_22, %c0_23, %c0_24] : memref<2x8x1xf32, #tpu.memory_space<vmem>>, vector<1x8x1xf32>
    %57 = vector.shape_cast %56 : vector<1x8x1xf32> to vector<8x1xf32>
    %cst_25 = arith.constant dense<0xFF800000> : vector<8xf32>
    %58 = vector.multi_reduction <maximumf>, %55, %cst_25 [1] : vector<8x8xf32> to vector<8xf32>
    %59 = vector.shape_cast %58 : vector<8xf32> to vector<8x1xf32>
    %60 = arith.maximumf %57, %59 : vector<8x1xf32>
    %61 = arith.subf %57, %60 : vector<8x1xf32>
    %62 = math.exp %61 : vector<8x1xf32>
    %63 = vector.broadcast %60 : vector<8x1xf32> to vector<8x8xf32>
    %64 = arith.subf %55, %63 : vector<8x8xf32>
    %65 = math.exp %64 : vector<8x8xf32>
    %c0_26 = arith.constant 0 : index
    %c0_27 = arith.constant 0 : index
    %c0_28 = arith.constant 0 : index
    %66 = vector.load %arg14[%c0_26, %c0_27, %c0_28] : memref<2x8x1xf32, #tpu.memory_space<vmem>>, vector<1x8x1xf32>
    %67 = vector.shape_cast %66 : vector<1x8x1xf32> to vector<8x1xf32>
    %68 = arith.mulf %62, %67 : vector<8x1xf32>
    %cst_29 = arith.constant dense<0.000000e+00> : vector<8xf32>
    %69 = vector.multi_reduction <add>, %65, %cst_29 [1] : vector<8x8xf32> to vector<8xf32>
    %70 = vector.shape_cast %69 : vector<8xf32> to vector<8x1xf32>
    %71 = arith.addf %68, %70 : vector<8x1xf32>
    %c0_30 = arith.constant 0 : index
    %c0_31 = arith.constant 0 : index
    %c0_32 = arith.constant 0 : index
    %72 = vector.load %arg14[%c0_30, %c0_31, %c0_32] : memref<2x8x1xf32, #tpu.memory_space<vmem>>, vector<1x8x1xf32>
    %73 = vector.shape_cast %72 : vector<1x8x1xf32> to vector<8x1xf32>
    %74 = vector.shape_cast %71 : vector<8x1xf32> to vector<1x8x1xf32>
    tpu.vector_store %arg14[%c0_30, %c0_31, %c0_32], %74 {strides = array<i32>} : memref<2x8x1xf32, #tpu.memory_space<vmem>>, vector<1x8x1xf32>,
    %c0_33 = arith.constant 0 : index
    %c0_34 = arith.constant 0 : index
    %c0_35 = arith.constant 0 : index
    %75 = vector.load %arg15[%c0_33, %c0_34, %c0_35] : memref<2x8x8xf32, #tpu.memory_space<vmem>>, vector<1x8x8xf32>
    %76 = vector.shape_cast %75 : vector<1x8x8xf32> to vector<8x8xf32>
    %77 = vector.broadcast %62 : vector<8x1xf32> to vector<8x8xf32>
    %78 = arith.mulf %77, %76 : vector<8x8xf32>
    %79 = arith.truncf %65 : vector<8x8xf32> to vector<8x8xbf16>
    %cst_36 = arith.constant dense<0.000000e+00> : vector<8x8xf32>
    %80 = tpu.matmul %79, %54, %cst_36 {dimension_numbers = #tpu.dot_dimension_numbers<[1], [0], [0], [1], [0, 0, 1, 1], [], []>} : vector<8x8xbf16>, vector<8x8xbf16>, vector<8x8xf32> -> vector<8x8xf32>
    %81 = arith.addf %78, %80 : vector<8x8xf32>
    %c0_37 = arith.constant 0 : index
    %c0_38 = arith.constant 0 : index
    %c0_39 = arith.constant 0 : index
    %82 = vector.load %arg15[%c0_37, %c0_38, %c0_39] : memref<2x8x8xf32, #tpu.memory_space<vmem>>, vector<1x8x8xf32>
    %83 = vector.shape_cast %82 : vector<1x8x8xf32> to vector<8x8xf32>
    %84 = vector.shape_cast %81 : vector<8x8xf32> to vector<1x8x8xf32>
    tpu.vector_store %arg15[%c0_37, %c0_38, %c0_39], %84 {strides = array<i32>} : memref<2x8x8xf32, #tpu.memory_space<vmem>>, vector<1x8x8xf32>,
    %c0_40 = arith.constant 0 : index
    %c0_41 = arith.constant 0 : index
    %c0_42 = arith.constant 0 : index
    %85 = vector.load %arg13[%c0_40, %c0_41, %c0_42] : memref<2x8x1xf32, #tpu.memory_space<vmem>>, vector<1x8x1xf32>
    %86 = vector.shape_cast %85 : vector<1x8x1xf32> to vector<8x1xf32>
    %87 = vector.shape_cast %60 : vector<8x1xf32> to vector<1x8x1xf32>
    tpu.vector_store %arg13[%c0_40, %c0_41, %c0_42], %87 {strides = array<i32>} : memref<2x8x1xf32, #tpu.memory_space<vmem>>, vector<1x8x1xf32>,
    %c1_43 = arith.constant 1 : index
    %c0_44 = arith.constant 0 : index
    %c0_45 = arith.constant 0 : index
    %88 = vector.load %arg12[%c1_43, %c0_44, %c0_45] : memref<2x8x8xf32, #tpu.memory_space<vmem>>, vector<1x8x8xf32>
    %89 = vector.shape_cast %88 : vector<1x8x8xf32> to vector<8x8xf32>
    %90 = arith.truncf %89 : vector<8x8xf32> to vector<8x8xbf16>
    %91 = vector.extract_strided_slice %41 {offsets = [0, 8], sizes = [8, 8], strides = [1, 1]} : vector<8x16xf32> to vector<8x8xf32>
    %92 = arith.truncf %91 : vector<8x8xf32> to vector<8x8xbf16>
    %93 = vector.extract_strided_slice %47 {offsets = [0, 8], sizes = [8, 8], strides = [1, 1]} : vector<8x16xf32> to vector<8x8xf32>
    %94 = arith.truncf %93 : vector<8x8xf32> to vector<8x8xbf16>
    %cst_46 = arith.constant dense<0.000000e+00> : vector<8x8xf32>
    %95 = tpu.matmul %90, %92, %cst_46 {dimension_numbers = #tpu.dot_dimension_numbers<[1], [1], [0], [0], [0, 0, 1, 0], [], []>} : vector<8x8xbf16>, vector<8x8xbf16>, vector<8x8xf32> -> vector<8x8xf32>
    %c1_47 = arith.constant 1 : index
    %c0_48 = arith.constant 0 : index
    %c0_49 = arith.constant 0 : index
    %96 = vector.load %arg13[%c1_47, %c0_48, %c0_49] : memref<2x8x1xf32, #tpu.memory_space<vmem>>, vector<1x8x1xf32>
    %97 = vector.shape_cast %96 : vector<1x8x1xf32> to vector<8x1xf32>
    %cst_50 = arith.constant dense<0xFF800000> : vector<8xf32>
    %98 = vector.multi_reduction <maximumf>, %95, %cst_50 [1] : vector<8x8xf32> to vector<8xf32>
    %99 = vector.shape_cast %98 : vector<8xf32> to vector<8x1xf32>
    %100 = arith.maximumf %97, %99 : vector<8x1xf32>
    %101 = arith.subf %97, %100 : vector<8x1xf32>
    %102 = math.exp %101 : vector<8x1xf32>
    %103 = vector.broadcast %100 : vector<8x1xf32> to vector<8x8xf32>
    %104 = arith.subf %95, %103 : vector<8x8xf32>
    %105 = math.exp %104 : vector<8x8xf32>
    %c1_51 = arith.constant 1 : index
    %c0_52 = arith.constant 0 : index
    %c0_53 = arith.constant 0 : index
    %106 = vector.load %arg14[%c1_51, %c0_52, %c0_53] : memref<2x8x1xf32, #tpu.memory_space<vmem>>, vector<1x8x1xf32>
    %107 = vector.shape_cast %106 : vector<1x8x1xf32> to vector<8x1xf32>
    %108 = arith.mulf %102, %107 : vector<8x1xf32>
    %cst_54 = arith.constant dense<0.000000e+00> : vector<8xf32>
    %109 = vector.multi_reduction <add>, %105, %cst_54 [1] : vector<8x8xf32> to vector<8xf32>
    %110 = vector.shape_cast %109 : vector<8xf32> to vector<8x1xf32>
    %111 = arith.addf %108, %110 : vector<8x1xf32>
    %c1_55 = arith.constant 1 : index
    %c0_56 = arith.constant 0 : index
    %c0_57 = arith.constant 0 : index
    %112 = vector.load %arg14[%c1_55, %c0_56, %c0_57] : memref<2x8x1xf32, #tpu.memory_space<vmem>>, vector<1x8x1xf32>
    %113 = vector.shape_cast %112 : vector<1x8x1xf32> to vector<8x1xf32>
    %114 = vector.shape_cast %111 : vector<8x1xf32> to vector<1x8x1xf32>
    tpu.vector_store %arg14[%c1_55, %c0_56, %c0_57], %114 {strides = array<i32>} : memref<2x8x1xf32, #tpu.memory_space<vmem>>, vector<1x8x1xf32>,
    %c1_58 = arith.constant 1 : index
    %c0_59 = arith.constant 0 : index
    %c0_60 = arith.constant 0 : index
    %115 = vector.load %arg15[%c1_58, %c0_59, %c0_60] : memref<2x8x8xf32, #tpu.memory_space<vmem>>, vector<1x8x8xf32>
    %116 = vector.shape_cast %115 : vector<1x8x8xf32> to vector<8x8xf32>
    %117 = vector.broadcast %102 : vector<8x1xf32> to vector<8x8xf32>
    %118 = arith.mulf %117, %116 : vector<8x8xf32>
    %119 = arith.truncf %105 : vector<8x8xf32> to vector<8x8xbf16>
    %cst_61 = arith.constant dense<0.000000e+00> : vector<8x8xf32>
    %120 = tpu.matmul %119, %94, %cst_61 {dimension_numbers = #tpu.dot_dimension_numbers<[1], [0], [0], [1], [0, 0, 1, 1], [], []>} : vector<8x8xbf16>, vector<8x8xbf16>, vector<8x8xf32> -> vector<8x8xf32>
    %121 = arith.addf %118, %120 : vector<8x8xf32>
    %c1_62 = arith.constant 1 : index
    %c0_63 = arith.constant 0 : index
    %c0_64 = arith.constant 0 : index
    %122 = vector.load %arg15[%c1_62, %c0_63, %c0_64] : memref<2x8x8xf32, #tpu.memory_space<vmem>>, vector<1x8x8xf32>
    %123 = vector.shape_cast %122 : vector<1x8x8xf32> to vector<8x8xf32>
    %124 = vector.shape_cast %121 : vector<8x8xf32> to vector<1x8x8xf32>
    tpu.vector_store %arg15[%c1_62, %c0_63, %c0_64], %124 {strides = array<i32>} : memref<2x8x8xf32, #tpu.memory_space<vmem>>, vector<1x8x8xf32>,
    %c1_65 = arith.constant 1 : index
    %c0_66 = arith.constant 0 : index
    %c0_67 = arith.constant 0 : index
    %125 = vector.load %arg13[%c1_65, %c0_66, %c0_67] : memref<2x8x1xf32, #tpu.memory_space<vmem>>, vector<1x8x1xf32>
    %126 = vector.shape_cast %125 : vector<1x8x1xf32> to vector<8x1xf32>
    %127 = vector.shape_cast %100 : vector<8x1xf32> to vector<1x8x1xf32>
    tpu.vector_store %arg13[%c1_65, %c0_66, %c0_67], %127 {strides = array<i32>} : memref<2x8x1xf32, #tpu.memory_space<vmem>>, vector<1x8x1xf32>,
    %c0_i32_68 = arith.constant 0 : i32
    %128 = arith.cmpi eq, %arg2, %c0_i32_68 : i32
    %129 = arith.extui %128 : i1 to i32
    %c0_i32_69 = arith.constant 0 : i32
    %130 = arith.cmpi ne, %129, %c0_i32_69 : i32
    scf.if %130 {
      %c0_70 = arith.constant 0 : index
      %c0_71 = arith.constant 0 : index
      %c0_72 = arith.constant 0 : index
      %131 = vector.load %arg15[%c0_70, %c0_71, %c0_72] : memref<2x8x8xf32, #tpu.memory_space<vmem>>, vector<1x8x8xf32>
      %132 = vector.shape_cast %131 : vector<1x8x8xf32> to vector<8x8xf32>
      %c0_73 = arith.constant 0 : index
      %c0_74 = arith.constant 0 : index
      %c0_75 = arith.constant 0 : index
      %133 = vector.load %arg14[%c0_73, %c0_74, %c0_75] : memref<2x8x1xf32, #tpu.memory_space<vmem>>, vector<1x8x1xf32>
      %134 = vector.shape_cast %133 : vector<1x8x1xf32> to vector<8x1xf32>
      %135 = tpu.reciprocal %134 {approx = true} : vector<8x1xf32> -> vector<8x1xf32>
      %136 = vector.broadcast %135 : vector<8x1xf32> to vector<8x8xf32>
      %137 = arith.mulf %132, %136 : vector<8x8xf32>
      %c1_76 = arith.constant 1 : index
      %c0_77 = arith.constant 0 : index
      %c0_78 = arith.constant 0 : index
      %138 = vector.load %arg15[%c1_76, %c0_77, %c0_78] : memref<2x8x8xf32, #tpu.memory_space<vmem>>, vector<1x8x8xf32>
      %139 = vector.shape_cast %138 : vector<1x8x8xf32> to vector<8x8xf32>
      %c1_79 = arith.constant 1 : index
      %c0_80 = arith.constant 0 : index
      %c0_81 = arith.constant 0 : index
      %140 = vector.load %arg14[%c1_79, %c0_80, %c0_81] : memref<2x8x1xf32, #tpu.memory_space<vmem>>, vector<1x8x1xf32>
      %141 = vector.shape_cast %140 : vector<1x8x1xf32> to vector<8x1xf32>
      %142 = tpu.reciprocal %141 {approx = true} : vector<8x1xf32> -> vector<8x1xf32>
      %143 = vector.broadcast %142 : vector<8x1xf32> to vector<8x8xf32>
      %144 = arith.mulf %139, %143 : vector<8x8xf32>
      %145 = tpu.concatenate %137, %144 in 1 : vector<8x8xf32>, vector<8x8xf32> -> vector<8x16xf32>
      %cst_82 = arith.constant dense<0.000000e+00> : vector<8xf32>
      %146 = vector.multi_reduction <add>, %145, %cst_82 [1] : vector<8x16xf32> to vector<8xf32>
      %147 = vector.shape_cast %146 : vector<8xf32> to vector<8x1xf32>
      %cst_83 = arith.constant 1.600000e+01 : f32
      %148 = vector.broadcast %cst_83 : f32 to vector<8x1xf32>
      %149 = arith.divf %147, %148 : vector<8x1xf32>
      %150 = vector.broadcast %149 : vector<8x1xf32> to vector<8x16xf32>
      %151 = arith.subf %145, %150 : vector<8x16xf32>
      %152 = arith.mulf %151, %151 : vector<8x16xf32>
      %cst_84 = arith.constant dense<0.000000e+00> : vector<8xf32>
      %153 = vector.multi_reduction <add>, %152, %cst_84 [1] : vector<8x16xf32> to vector<8xf32>
      %154 = vector.shape_cast %153 : vector<8xf32> to vector<8x1xf32>
      %cst_85 = arith.constant 1.600000e+01 : f32
      %155 = vector.broadcast %cst_85 : f32 to vector<8x1xf32>
      %156 = arith.divf %154, %155 : vector<8x1xf32>
      %157 = vector.broadcast %149 : vector<8x1xf32> to vector<8x16xf32>
      %158 = arith.subf %145, %157 : vector<8x16xf32>
      %cst_86 = arith.constant 9.99999974E-6 : f32
      %159 = vector.broadcast %cst_86 : f32 to vector<8x1xf32>
      %160 = arith.addf %156, %159 : vector<8x1xf32>
      %161 = math.rsqrt %160 : vector<8x1xf32>
      %162 = vector.broadcast %161 : vector<8x1xf32> to vector<8x16xf32>
      %163 = arith.mulf %158, %162 : vector<8x16xf32>
      %c0_87 = arith.constant 0 : index
      %c0_88 = arith.constant 0 : index
      %164 = vector.load %arg9[%c0_87, %c0_88] : memref<2x16xf32, #tpu.memory_space<vmem>>, vector<2x16xf32>
      %165 = vector.extract_strided_slice %164 {offsets = [0, 0], sizes = [1, 16], strides = [1, 1]} : vector<2x16xf32> to vector<1x16xf32>
      %166 = vector.broadcast %165 : vector<1x16xf32> to vector<8x16xf32>
      %167 = arith.mulf %163, %166 : vector<8x16xf32>
      %168 = vector.extract_strided_slice %164 {offsets = [1, 0], sizes = [1, 16], strides = [1, 1]} : vector<2x16xf32> to vector<1x16xf32>
      %169 = vector.broadcast %168 : vector<1x16xf32> to vector<8x16xf32>
      %170 = arith.addf %167, %169 : vector<8x16xf32>
      %171 = arith.mulf %170, %170 : vector<8x16xf32>
      %cst_89 = arith.constant dense<0.000000e+00> : vector<8xf32>
      %172 = vector.multi_reduction <add>, %171, %cst_89 [1] : vector<8x16xf32> to vector<8xf32>
      %173 = vector.shape_cast %172 : vector<8xf32> to vector<8x1xf32>
      %cst_90 = arith.constant 1.600000e+01 : f32
      %174 = vector.broadcast %cst_90 : f32 to vector<8x1xf32>
      %175 = arith.divf %173, %174 : vector<8x1xf32>
      %cst_91 = arith.constant 9.99999997E-7 : f32
      %176 = vector.broadcast %cst_91 : f32 to vector<8x1xf32>
      %177 = arith.addf %175, %176 : vector<8x1xf32>
      %178 = math.rsqrt %177 : vector<8x1xf32>
      %179 = vector.broadcast %178 : vector<8x1xf32> to vector<8x16xf32>
      %180 = arith.mulf %170, %179 : vector<8x16xf32>
      %181 = math.absf %180 : vector<8x16xf32>
      %cst_92 = arith.constant dense<0xFF800000> : vector<8xf32>
      %182 = vector.multi_reduction <maximumf>, %181, %cst_92 [1] : vector<8x16xf32> to vector<8xf32>
      %183 = vector.shape_cast %182 : vector<8xf32> to vector<8x1xf32>
      %cst_93 = arith.constant 9.99999974E-6 : f32
      %184 = vector.broadcast %cst_93 : f32 to vector<8x1xf32>
      %185 = arith.maximumf %183, %184 : vector<8x1xf32>
      %cst_94 = arith.constant 1.270000e+02 : f32
      %186 = vector.broadcast %cst_94 : f32 to vector<8x1xf32>
      %187 = arith.divf %186, %185 : vector<8x1xf32>
      %188 = vector.broadcast %187 : vector<8x1xf32> to vector<8x16xf32>
      %189 = arith.mulf %180, %188 : vector<8x16xf32>
      %190 = math.roundeven %189 : vector<8x16xf32>
      %cst_95 = arith.constant -1.280000e+02 : f32
      %cst_96 = arith.constant 1.270000e+02 : f32
      %191 = vector.broadcast %cst_95 : f32 to vector<8x16xf32>
      %192 = arith.maximumf %191, %190 : vector<8x16xf32>
      %193 = vector.broadcast %cst_96 : f32 to vector<8x16xf32>
      %194 = arith.minimumf %193, %192 : vector<8x16xf32>
      %cst_97 = arith.constant 0.00787401571 : f32
      %195 = vector.broadcast %cst_97 : f32 to vector<8x1xf32>
      %196 = arith.mulf %185, %195 : vector<8x1xf32>
      %197 = arith.fptosi %194 : vector<8x16xf32> to vector<8x16xi8>
      %c0_98 = arith.constant 0 : index
      %c0_99 = arith.constant 0 : index
      %198 = vector.load %arg8[%c0_98, %c0_99] : memref<16x32xi8, #tpu.memory_space<vmem>>, vector<16x32xi8>
      %cst_100 = arith.constant dense<0> : vector<8x32xi32>
      %199 = tpu.matmul %197, %198, %cst_100 {dimension_numbers = #tpu.dot_dimension_numbers<[1], [0], [0], [1], [0, 0, 1, 1], [], []>} : vector<8x16xi8>, vector<16x32xi8>, vector<8x32xi32> -> vector<8x32xi32>
      %200 = arith.sitofp %199 : vector<8x32xi32> to vector<8x32xf32>
      %201 = vector.broadcast %2 : f32 to vector<8x1xf32>
      %202 = arith.mulf %196, %201 : vector<8x1xf32>
      %203 = vector.broadcast %202 : vector<8x1xf32> to vector<8x32xf32>
      %204 = arith.mulf %200, %203 : vector<8x32xf32>
      %c0_101 = arith.constant 0 : index
      %c0_102 = arith.constant 0 : index
      %c0_103 = arith.constant 0 : index
      %205 = vector.load %arg11[%c0_101, %c0_102, %c0_103] : memref<1x8x32xf32, #tpu.memory_space<vmem>>, vector<1x8x32xf32>
      %206 = vector.shape_cast %205 : vector<1x8x32xf32> to vector<8x32xf32>
      %207 = vector.shape_cast %204 : vector<8x32xf32> to vector<1x8x32xf32>
      tpu.vector_store %arg11[%c0_101, %c0_102, %c0_103], %207 {strides = array<i32>} : memref<1x8x32xf32, #tpu.memory_space<vmem>>, vector<1x8x32xf32>,
    } else {
    }
    return
  }
  func.func @transform_0(%arg0: i32, %arg1: i32, %arg2: i32) -> (i32, i32, i32) {
    %c0_i32 = arith.constant 0 : i32
    %c0_i32_0 = arith.constant 0 : i32
    return %arg0, %arg1, %c0_i32 : i32, i32, i32
  }
  func.func @transform_1(%arg0: i32, %arg1: i32, %arg2: i32) -> (i32, i32, i32) {
    %c0_i32 = arith.constant 0 : i32
    %c0_i32_0 = arith.constant 0 : i32
    return %arg0, %arg2, %c0_i32 : i32, i32, i32
  }
  func.func @transform_2(%arg0: i32, %arg1: i32, %arg2: i32) -> (i32, i32) {
    %c0_i32 = arith.constant 0 : i32
    %c0_i32_0 = arith.constant 0 : i32
    %c0_i32_1 = arith.constant 0 : i32
    return %c0_i32, %c0_i32_0 : i32, i32
  }
  func.func @transform_3(%arg0: i32, %arg1: i32, %arg2: i32) -> (i32, i32) {
    %c0_i32 = arith.constant 0 : i32
    %c0_i32_0 = arith.constant 0 : i32
    %c0_i32_1 = arith.constant 0 : i32
    return %c0_i32, %c0_i32_0 : i32, i32
  }
  func.func @transform_4(%arg0: i32, %arg1: i32, %arg2: i32) -> (i32, i32) {
    %c0_i32 = arith.constant 0 : i32
    %c0_i32_0 = arith.constant 0 : i32
    %c0_i32_1 = arith.constant 0 : i32
    return %c0_i32, %c0_i32_0 : i32, i32
  }
  func.func @transform_5(%arg0: i32, %arg1: i32, %arg2: i32) -> (i32, i32) {
    %c0_i32 = arith.constant 0 : i32
    %c0_i32_0 = arith.constant 0 : i32
    %c0_i32_1 = arith.constant 0 : i32
    return %c0_i32, %c0_i32_0 : i32, i32
  }
  func.func @transform_6(%arg0: i32, %arg1: i32, %arg2: i32) -> (i32, i32) {
    %c0_i32 = arith.constant 0 : i32
    %c0_i32_0 = arith.constant 0 : i32
    %c0_i32_1 = arith.constant 0 : i32
    return %c0_i32, %c0_i32_0 : i32, i32
  }
  func.func @transform_7(%arg0: i32, %arg1: i32, %arg2: i32) -> i32 {
    %c0_i32 = arith.constant 0 : i32
    %c0_i32_0 = arith.constant 0 : i32
    return %c0_i32 : i32
  }
  func.func @transform_8(%arg0: i32, %arg1: i32, %arg2: i32) -> (i32, i32, i32) {
    %c0_i32 = arith.constant 0 : i32
    %c0_i32_0 = arith.constant 0 : i32
    return %arg0, %arg1, %c0_i32 : i32, i32, i32
  }
}

module attributes {stable_mosaic.version = 11 : i64} {
  func.func @bit_mgqa_flash_kernel(%arg0: i32, %arg1: i32, %arg2: i32, %arg3: memref<1x8x32xf32, #tpu.memory_space<vmem>>, %arg4: memref<1x8x32xf32, #tpu.memory_space<vmem>>, %arg5: memref<32x16xbf16, #tpu.memory_space<vmem>>, %arg6: memref<32x16xbf16, #tpu.memory_space<vmem>>, %arg7: memref<32x16xbf16, #tpu.memory_space<vmem>>, %arg8: memref<16x32xbf16, #tpu.memory_space<vmem>>, %arg9: memref<2x16xf32, #tpu.memory_space<vmem>>, %arg10: memref<4xf32, #tpu.memory_space<smem>>, %arg11: memref<1x8x32xf32, #tpu.memory_space<vmem>>, %arg12: memref<2x8x8xf32, #tpu.memory_space<vmem>>, %arg13: memref<2x8x1xf32, #tpu.memory_space<vmem>>, %arg14: memref<2x8x1xf32, #tpu.memory_space<vmem>>, %arg15: memref<2x8x8xf32, #tpu.memory_space<vmem>>) attributes {dimension_semantics = [#tpu.dimension_semantics<parallel>, #tpu.dimension_semantics<parallel>, #tpu.dimension_semantics<arbitrary>], iteration_bounds = array<i64: 2, 1, 1>, scalar_prefetch = 0 : i64, scratch_operands = 4 : i64, tpu.core_type = #tpu.core_type<tc>, window_params = [{transform_indices = @transform_0, window_bounds = array<i64: 1, 8, 32>}, {transform_indices = @transform_1, window_bounds = array<i64: 1, 8, 32>}, {pipeline_mode = #tpu.pipeline_mode<synchronous>, transform_indices = @transform_2, window_bounds = array<i64: 32, 16>}, {pipeline_mode = #tpu.pipeline_mode<synchronous>, transform_indices = @transform_3, window_bounds = array<i64: 32, 16>}, {pipeline_mode = #tpu.pipeline_mode<synchronous>, transform_indices = @transform_4, window_bounds = array<i64: 32, 16>}, {pipeline_mode = #tpu.pipeline_mode<synchronous>, transform_indices = @transform_5, window_bounds = array<i64: 16, 32>}, {pipeline_mode = #tpu.pipeline_mode<synchronous>, transform_indices = @transform_6, window_bounds = array<i64: 2, 16>}, {transform_indices = @transform_7, window_bounds = array<i64: 4>}, {transform_indices = @transform_8, window_bounds = array<i64: 1, 8, 32>}]} {
    %c0 = arith.constant 0 : index
    %0 = memref.load %arg10[%c0] : memref<4xf32, #tpu.memory_space<smem>>
    %c1 = arith.constant 1 : index
    %1 = memref.load %arg10[%c1] : memref<4xf32, #tpu.memory_space<smem>>
    %c3 = arith.constant 3 : index
    %2 = memref.load %arg10[%c3] : memref<4xf32, #tpu.memory_space<smem>>
    %c0_i32 = arith.constant 0 : i32
    %3 = arith.cmpi eq, %arg2, %c0_i32 : i32
    %4 = arith.extui %3 : i1 to i32
    %c0_i32_0 = arith.constant 0 : i32
    %5 = arith.cmpi ne, %4, %c0_i32_0 : i32
    scf.if %5 {
      %c0_70 = arith.constant 0 : index
      %c0_71 = arith.constant 0 : index
      %c0_72 = arith.constant 0 : index
      %129 = vector.load %arg3[%c0_70, %c0_71, %c0_72] : memref<1x8x32xf32, #tpu.memory_space<vmem>>, vector<1x8x32xf32>
      %130 = vector.shape_cast %129 : vector<1x8x32xf32> to vector<8x32xf32>
      %131 = arith.mulf %130, %130 : vector<8x32xf32>
      %cst_73 = arith.constant dense<0.000000e+00> : vector<8xf32>
      %132 = vector.multi_reduction <add>, %131, %cst_73 [1] : vector<8x32xf32> to vector<8xf32>
      %133 = vector.shape_cast %132 : vector<8xf32> to vector<8x1xf32>
      %cst_74 = arith.constant 3.200000e+01 : f32
      %134 = vector.broadcast %cst_74 : f32 to vector<8x1xf32>
      %135 = arith.divf %133, %134 : vector<8x1xf32>
      %cst_75 = arith.constant 9.99999997E-7 : f32
      %136 = vector.broadcast %cst_75 : f32 to vector<8x1xf32>
      %137 = arith.addf %135, %136 : vector<8x1xf32>
      %138 = math.rsqrt %137 : vector<8x1xf32>
      %139 = vector.broadcast %138 : vector<8x1xf32> to vector<8x32xf32>
      %140 = arith.mulf %130, %139 : vector<8x32xf32>
      %141 = math.absf %140 : vector<8x32xf32>
      %cst_76 = arith.constant dense<0xFF800000> : vector<8xf32>
      %142 = vector.multi_reduction <maximumf>, %141, %cst_76 [1] : vector<8x32xf32> to vector<8xf32>
      %143 = vector.shape_cast %142 : vector<8xf32> to vector<8x1xf32>
      %cst_77 = arith.constant 9.99999974E-6 : f32
      %144 = vector.broadcast %cst_77 : f32 to vector<8x1xf32>
      %145 = arith.maximumf %143, %144 : vector<8x1xf32>
      %cst_78 = arith.constant 1.270000e+02 : f32
      %146 = vector.broadcast %cst_78 : f32 to vector<8x1xf32>
      %147 = arith.divf %146, %145 : vector<8x1xf32>
      %148 = vector.broadcast %147 : vector<8x1xf32> to vector<8x32xf32>
      %149 = arith.mulf %140, %148 : vector<8x32xf32>
      %150 = math.roundeven %149 : vector<8x32xf32>
      %cst_79 = arith.constant -1.280000e+02 : f32
      %cst_80 = arith.constant 1.270000e+02 : f32
      %151 = vector.broadcast %cst_79 : f32 to vector<8x32xf32>
      %152 = arith.maximumf %151, %150 : vector<8x32xf32>
      %153 = vector.broadcast %cst_80 : f32 to vector<8x32xf32>
      %154 = arith.minimumf %153, %152 : vector<8x32xf32>
      %cst_81 = arith.constant 0.00787401571 : f32
      %155 = vector.broadcast %cst_81 : f32 to vector<8x1xf32>
      %156 = arith.mulf %145, %155 : vector<8x1xf32>
      %157 = arith.truncf %154 : vector<8x32xf32> to vector<8x32xbf16>
      %c0_82 = arith.constant 0 : index
      %c0_83 = arith.constant 0 : index
      %158 = vector.load %arg5[%c0_82, %c0_83] : memref<32x16xbf16, #tpu.memory_space<vmem>>, vector<32x16xbf16>
      %cst_84 = arith.constant dense<0.000000e+00> : vector<8x16xf32>
      %159 = tpu.matmul %157, %158, %cst_84 {dimension_numbers = #tpu.dot_dimension_numbers<[1], [0], [0], [1], [0, 0, 1, 1], [], []>} : vector<8x32xbf16>, vector<32x16xbf16>, vector<8x16xf32> -> vector<8x16xf32>
      %cst_85 = arith.constant 1.250000e-01 : f32
      %160 = arith.mulf %0, %cst_85 : f32
      %161 = vector.broadcast %160 : f32 to vector<8x1xf32>
      %162 = arith.mulf %156, %161 : vector<8x1xf32>
      %163 = vector.broadcast %162 : vector<8x1xf32> to vector<8x16xf32>
      %164 = arith.mulf %159, %163 : vector<8x16xf32>
      %165 = vector.extract_strided_slice %164 {offsets = [0, 0], sizes = [8, 8], strides = [1, 1]} : vector<8x16xf32> to vector<8x8xf32>
      %c0_86 = arith.constant 0 : index
      %c0_87 = arith.constant 0 : index
      %c0_88 = arith.constant 0 : index
      %166 = vector.load %arg12[%c0_86, %c0_87, %c0_88] : memref<2x8x8xf32, #tpu.memory_space<vmem>>, vector<1x8x8xf32>
      %167 = vector.shape_cast %166 : vector<1x8x8xf32> to vector<8x8xf32>
      %168 = vector.shape_cast %165 : vector<8x8xf32> to vector<1x8x8xf32>
      tpu.vector_store %arg12[%c0_86, %c0_87, %c0_88], %168 {strides = array<i32>} : memref<2x8x8xf32, #tpu.memory_space<vmem>>, vector<1x8x8xf32>,
      %169 = vector.extract_strided_slice %164 {offsets = [0, 8], sizes = [8, 8], strides = [1, 1]} : vector<8x16xf32> to vector<8x8xf32>
      %c1_89 = arith.constant 1 : index
      %c0_90 = arith.constant 0 : index
      %c0_91 = arith.constant 0 : index
      %170 = vector.load %arg12[%c1_89, %c0_90, %c0_91] : memref<2x8x8xf32, #tpu.memory_space<vmem>>, vector<1x8x8xf32>
      %171 = vector.shape_cast %170 : vector<1x8x8xf32> to vector<8x8xf32>
      %172 = vector.shape_cast %169 : vector<8x8xf32> to vector<1x8x8xf32>
      tpu.vector_store %arg12[%c1_89, %c0_90, %c0_91], %172 {strides = array<i32>} : memref<2x8x8xf32, #tpu.memory_space<vmem>>, vector<1x8x8xf32>,
      %cst_92 = arith.constant 0xFF800000 : f32
      %173 = vector.broadcast %cst_92 : f32 to vector<2x8x1xf32>
      %c0_93 = arith.constant 0 : index
      %c0_94 = arith.constant 0 : index
      %c0_95 = arith.constant 0 : index
      %174 = vector.load %arg13[%c0_93, %c0_94, %c0_95] : memref<2x8x1xf32, #tpu.memory_space<vmem>>, vector<2x8x1xf32>
      tpu.vector_store %arg13[%c0_93, %c0_94, %c0_95], %173 {strides = array<i32>} : memref<2x8x1xf32, #tpu.memory_space<vmem>>, vector<2x8x1xf32>,
      %cst_96 = arith.constant 0.000000e+00 : f32
      %175 = vector.broadcast %cst_96 : f32 to vector<2x8x1xf32>
      %c0_97 = arith.constant 0 : index
      %c0_98 = arith.constant 0 : index
      %c0_99 = arith.constant 0 : index
      %176 = vector.load %arg14[%c0_97, %c0_98, %c0_99] : memref<2x8x1xf32, #tpu.memory_space<vmem>>, vector<2x8x1xf32>
      tpu.vector_store %arg14[%c0_97, %c0_98, %c0_99], %175 {strides = array<i32>} : memref<2x8x1xf32, #tpu.memory_space<vmem>>, vector<2x8x1xf32>,
      %cst_100 = arith.constant 0.000000e+00 : f32
      %177 = vector.broadcast %cst_100 : f32 to vector<2x8x8xf32>
      %c0_101 = arith.constant 0 : index
      %c0_102 = arith.constant 0 : index
      %c0_103 = arith.constant 0 : index
      %178 = vector.load %arg15[%c0_101, %c0_102, %c0_103] : memref<2x8x8xf32, #tpu.memory_space<vmem>>, vector<2x8x8xf32>
      tpu.vector_store %arg15[%c0_101, %c0_102, %c0_103], %177 {strides = array<i32>} : memref<2x8x8xf32, #tpu.memory_space<vmem>>, vector<2x8x8xf32>,
    } else {
    }
    %c0_1 = arith.constant 0 : index
    %c0_2 = arith.constant 0 : index
    %c0_3 = arith.constant 0 : index
    %6 = vector.load %arg4[%c0_1, %c0_2, %c0_3] : memref<1x8x32xf32, #tpu.memory_space<vmem>>, vector<1x8x32xf32>
    %7 = vector.shape_cast %6 : vector<1x8x32xf32> to vector<8x32xf32>
    %8 = arith.mulf %7, %7 : vector<8x32xf32>
    %cst = arith.constant dense<0.000000e+00> : vector<8xf32>
    %9 = vector.multi_reduction <add>, %8, %cst [1] : vector<8x32xf32> to vector<8xf32>
    %10 = vector.shape_cast %9 : vector<8xf32> to vector<8x1xf32>
    %cst_4 = arith.constant 3.200000e+01 : f32
    %11 = vector.broadcast %cst_4 : f32 to vector<8x1xf32>
    %12 = arith.divf %10, %11 : vector<8x1xf32>
    %cst_5 = arith.constant 9.99999997E-7 : f32
    %13 = vector.broadcast %cst_5 : f32 to vector<8x1xf32>
    %14 = arith.addf %12, %13 : vector<8x1xf32>
    %15 = math.rsqrt %14 : vector<8x1xf32>
    %16 = vector.broadcast %15 : vector<8x1xf32> to vector<8x32xf32>
    %17 = arith.mulf %7, %16 : vector<8x32xf32>
    %18 = math.absf %17 : vector<8x32xf32>
    %cst_6 = arith.constant dense<0xFF800000> : vector<8xf32>
    %19 = vector.multi_reduction <maximumf>, %18, %cst_6 [1] : vector<8x32xf32> to vector<8xf32>
    %20 = vector.shape_cast %19 : vector<8xf32> to vector<8x1xf32>
    %cst_7 = arith.constant 9.99999974E-6 : f32
    %21 = vector.broadcast %cst_7 : f32 to vector<8x1xf32>
    %22 = arith.maximumf %20, %21 : vector<8x1xf32>
    %cst_8 = arith.constant 1.270000e+02 : f32
    %23 = vector.broadcast %cst_8 : f32 to vector<8x1xf32>
    %24 = arith.divf %23, %22 : vector<8x1xf32>
    %25 = vector.broadcast %24 : vector<8x1xf32> to vector<8x32xf32>
    %26 = arith.mulf %17, %25 : vector<8x32xf32>
    %27 = math.roundeven %26 : vector<8x32xf32>
    %cst_9 = arith.constant -1.280000e+02 : f32
    %cst_10 = arith.constant 1.270000e+02 : f32
    %28 = vector.broadcast %cst_9 : f32 to vector<8x32xf32>
    %29 = arith.maximumf %28, %27 : vector<8x32xf32>
    %30 = vector.broadcast %cst_10 : f32 to vector<8x32xf32>
    %31 = arith.minimumf %30, %29 : vector<8x32xf32>
    %cst_11 = arith.constant 0.00787401571 : f32
    %32 = vector.broadcast %cst_11 : f32 to vector<8x1xf32>
    %33 = arith.mulf %22, %32 : vector<8x1xf32>
    %34 = arith.truncf %31 : vector<8x32xf32> to vector<8x32xbf16>
    %c0_12 = arith.constant 0 : index
    %c0_13 = arith.constant 0 : index
    %35 = vector.load %arg6[%c0_12, %c0_13] : memref<32x16xbf16, #tpu.memory_space<vmem>>, vector<32x16xbf16>
    %cst_14 = arith.constant dense<0.000000e+00> : vector<8x16xf32>
    %36 = tpu.matmul %34, %35, %cst_14 {dimension_numbers = #tpu.dot_dimension_numbers<[1], [0], [0], [1], [0, 0, 1, 1], [], []>} : vector<8x32xbf16>, vector<32x16xbf16>, vector<8x16xf32> -> vector<8x16xf32>
    %37 = vector.broadcast %1 : f32 to vector<8x1xf32>
    %38 = arith.mulf %33, %37 : vector<8x1xf32>
    %39 = vector.broadcast %38 : vector<8x1xf32> to vector<8x16xf32>
    %40 = arith.mulf %36, %39 : vector<8x16xf32>
    %41 = arith.truncf %31 : vector<8x32xf32> to vector<8x32xbf16>
    %c0_15 = arith.constant 0 : index
    %c0_16 = arith.constant 0 : index
    %42 = vector.load %arg7[%c0_15, %c0_16] : memref<32x16xbf16, #tpu.memory_space<vmem>>, vector<32x16xbf16>
    %cst_17 = arith.constant dense<0.000000e+00> : vector<8x16xf32>
    %43 = tpu.matmul %41, %42, %cst_17 {dimension_numbers = #tpu.dot_dimension_numbers<[1], [0], [0], [1], [0, 0, 1, 1], [], []>} : vector<8x32xbf16>, vector<32x16xbf16>, vector<8x16xf32> -> vector<8x16xf32>
    %44 = vector.broadcast %33 : vector<8x1xf32> to vector<8x16xf32>
    %45 = arith.mulf %43, %44 : vector<8x16xf32>
    %c0_18 = arith.constant 0 : index
    %c0_19 = arith.constant 0 : index
    %c0_20 = arith.constant 0 : index
    %46 = vector.load %arg12[%c0_18, %c0_19, %c0_20] : memref<2x8x8xf32, #tpu.memory_space<vmem>>, vector<1x8x8xf32>
    %47 = vector.shape_cast %46 : vector<1x8x8xf32> to vector<8x8xf32>
    %48 = arith.truncf %47 : vector<8x8xf32> to vector<8x8xbf16>
    %49 = vector.extract_strided_slice %40 {offsets = [0, 0], sizes = [8, 8], strides = [1, 1]} : vector<8x16xf32> to vector<8x8xf32>
    %50 = arith.truncf %49 : vector<8x8xf32> to vector<8x8xbf16>
    %51 = vector.extract_strided_slice %45 {offsets = [0, 0], sizes = [8, 8], strides = [1, 1]} : vector<8x16xf32> to vector<8x8xf32>
    %52 = arith.truncf %51 : vector<8x8xf32> to vector<8x8xbf16>
    %cst_21 = arith.constant dense<0.000000e+00> : vector<8x8xf32>
    %53 = tpu.matmul %48, %50, %cst_21 {dimension_numbers = #tpu.dot_dimension_numbers<[1], [1], [0], [0], [0, 0, 1, 0], [], []>} : vector<8x8xbf16>, vector<8x8xbf16>, vector<8x8xf32> -> vector<8x8xf32>
    %c0_22 = arith.constant 0 : index
    %c0_23 = arith.constant 0 : index
    %c0_24 = arith.constant 0 : index
    %54 = vector.load %arg13[%c0_22, %c0_23, %c0_24] : memref<2x8x1xf32, #tpu.memory_space<vmem>>, vector<1x8x1xf32>
    %55 = vector.shape_cast %54 : vector<1x8x1xf32> to vector<8x1xf32>
    %cst_25 = arith.constant dense<0xFF800000> : vector<8xf32>
    %56 = vector.multi_reduction <maximumf>, %53, %cst_25 [1] : vector<8x8xf32> to vector<8xf32>
    %57 = vector.shape_cast %56 : vector<8xf32> to vector<8x1xf32>
    %58 = arith.maximumf %55, %57 : vector<8x1xf32>
    %59 = arith.subf %55, %58 : vector<8x1xf32>
    %60 = math.exp %59 : vector<8x1xf32>
    %61 = vector.broadcast %58 : vector<8x1xf32> to vector<8x8xf32>
    %62 = arith.subf %53, %61 : vector<8x8xf32>
    %63 = math.exp %62 : vector<8x8xf32>
    %c0_26 = arith.constant 0 : index
    %c0_27 = arith.constant 0 : index
    %c0_28 = arith.constant 0 : index
    %64 = vector.load %arg14[%c0_26, %c0_27, %c0_28] : memref<2x8x1xf32, #tpu.memory_space<vmem>>, vector<1x8x1xf32>
    %65 = vector.shape_cast %64 : vector<1x8x1xf32> to vector<8x1xf32>
    %66 = arith.mulf %60, %65 : vector<8x1xf32>
    %cst_29 = arith.constant dense<0.000000e+00> : vector<8xf32>
    %67 = vector.multi_reduction <add>, %63, %cst_29 [1] : vector<8x8xf32> to vector<8xf32>
    %68 = vector.shape_cast %67 : vector<8xf32> to vector<8x1xf32>
    %69 = arith.addf %66, %68 : vector<8x1xf32>
    %c0_30 = arith.constant 0 : index
    %c0_31 = arith.constant 0 : index
    %c0_32 = arith.constant 0 : index
    %70 = vector.load %arg14[%c0_30, %c0_31, %c0_32] : memref<2x8x1xf32, #tpu.memory_space<vmem>>, vector<1x8x1xf32>
    %71 = vector.shape_cast %70 : vector<1x8x1xf32> to vector<8x1xf32>
    %72 = vector.shape_cast %69 : vector<8x1xf32> to vector<1x8x1xf32>
    tpu.vector_store %arg14[%c0_30, %c0_31, %c0_32], %72 {strides = array<i32>} : memref<2x8x1xf32, #tpu.memory_space<vmem>>, vector<1x8x1xf32>,
    %c0_33 = arith.constant 0 : index
    %c0_34 = arith.constant 0 : index
    %c0_35 = arith.constant 0 : index
    %73 = vector.load %arg15[%c0_33, %c0_34, %c0_35] : memref<2x8x8xf32, #tpu.memory_space<vmem>>, vector<1x8x8xf32>
    %74 = vector.shape_cast %73 : vector<1x8x8xf32> to vector<8x8xf32>
    %75 = vector.broadcast %60 : vector<8x1xf32> to vector<8x8xf32>
    %76 = arith.mulf %75, %74 : vector<8x8xf32>
    %77 = arith.truncf %63 : vector<8x8xf32> to vector<8x8xbf16>
    %cst_36 = arith.constant dense<0.000000e+00> : vector<8x8xf32>
    %78 = tpu.matmul %77, %52, %cst_36 {dimension_numbers = #tpu.dot_dimension_numbers<[1], [0], [0], [1], [0, 0, 1, 1], [], []>} : vector<8x8xbf16>, vector<8x8xbf16>, vector<8x8xf32> -> vector<8x8xf32>
    %79 = arith.addf %76, %78 : vector<8x8xf32>
    %c0_37 = arith.constant 0 : index
    %c0_38 = arith.constant 0 : index
    %c0_39 = arith.constant 0 : index
    %80 = vector.load %arg15[%c0_37, %c0_38, %c0_39] : memref<2x8x8xf32, #tpu.memory_space<vmem>>, vector<1x8x8xf32>
    %81 = vector.shape_cast %80 : vector<1x8x8xf32> to vector<8x8xf32>
    %82 = vector.shape_cast %79 : vector<8x8xf32> to vector<1x8x8xf32>
    tpu.vector_store %arg15[%c0_37, %c0_38, %c0_39], %82 {strides = array<i32>} : memref<2x8x8xf32, #tpu.memory_space<vmem>>, vector<1x8x8xf32>,
    %c0_40 = arith.constant 0 : index
    %c0_41 = arith.constant 0 : index
    %c0_42 = arith.constant 0 : index
    %83 = vector.load %arg13[%c0_40, %c0_41, %c0_42] : memref<2x8x1xf32, #tpu.memory_space<vmem>>, vector<1x8x1xf32>
    %84 = vector.shape_cast %83 : vector<1x8x1xf32> to vector<8x1xf32>
    %85 = vector.shape_cast %58 : vector<8x1xf32> to vector<1x8x1xf32>
    tpu.vector_store %arg13[%c0_40, %c0_41, %c0_42], %85 {strides = array<i32>} : memref<2x8x1xf32, #tpu.memory_space<vmem>>, vector<1x8x1xf32>,
    %c1_43 = arith.constant 1 : index
    %c0_44 = arith.constant 0 : index
    %c0_45 = arith.constant 0 : index
    %86 = vector.load %arg12[%c1_43, %c0_44, %c0_45] : memref<2x8x8xf32, #tpu.memory_space<vmem>>, vector<1x8x8xf32>
    %87 = vector.shape_cast %86 : vector<1x8x8xf32> to vector<8x8xf32>
    %88 = arith.truncf %87 : vector<8x8xf32> to vector<8x8xbf16>
    %89 = vector.extract_strided_slice %40 {offsets = [0, 8], sizes = [8, 8], strides = [1, 1]} : vector<8x16xf32> to vector<8x8xf32>
    %90 = arith.truncf %89 : vector<8x8xf32> to vector<8x8xbf16>
    %91 = vector.extract_strided_slice %45 {offsets = [0, 8], sizes = [8, 8], strides = [1, 1]} : vector<8x16xf32> to vector<8x8xf32>
    %92 = arith.truncf %91 : vector<8x8xf32> to vector<8x8xbf16>
    %cst_46 = arith.constant dense<0.000000e+00> : vector<8x8xf32>
    %93 = tpu.matmul %88, %90, %cst_46 {dimension_numbers = #tpu.dot_dimension_numbers<[1], [1], [0], [0], [0, 0, 1, 0], [], []>} : vector<8x8xbf16>, vector<8x8xbf16>, vector<8x8xf32> -> vector<8x8xf32>
    %c1_47 = arith.constant 1 : index
    %c0_48 = arith.constant 0 : index
    %c0_49 = arith.constant 0 : index
    %94 = vector.load %arg13[%c1_47, %c0_48, %c0_49] : memref<2x8x1xf32, #tpu.memory_space<vmem>>, vector<1x8x1xf32>
    %95 = vector.shape_cast %94 : vector<1x8x1xf32> to vector<8x1xf32>
    %cst_50 = arith.constant dense<0xFF800000> : vector<8xf32>
    %96 = vector.multi_reduction <maximumf>, %93, %cst_50 [1] : vector<8x8xf32> to vector<8xf32>
    %97 = vector.shape_cast %96 : vector<8xf32> to vector<8x1xf32>
    %98 = arith.maximumf %95, %97 : vector<8x1xf32>
    %99 = arith.subf %95, %98 : vector<8x1xf32>
    %100 = math.exp %99 : vector<8x1xf32>
    %101 = vector.broadcast %98 : vector<8x1xf32> to vector<8x8xf32>
    %102 = arith.subf %93, %101 : vector<8x8xf32>
    %103 = math.exp %102 : vector<8x8xf32>
    %c1_51 = arith.constant 1 : index
    %c0_52 = arith.constant 0 : index
    %c0_53 = arith.constant 0 : index
    %104 = vector.load %arg14[%c1_51, %c0_52, %c0_53] : memref<2x8x1xf32, #tpu.memory_space<vmem>>, vector<1x8x1xf32>
    %105 = vector.shape_cast %104 : vector<1x8x1xf32> to vector<8x1xf32>
    %106 = arith.mulf %100, %105 : vector<8x1xf32>
    %cst_54 = arith.constant dense<0.000000e+00> : vector<8xf32>
    %107 = vector.multi_reduction <add>, %103, %cst_54 [1] : vector<8x8xf32> to vector<8xf32>
    %108 = vector.shape_cast %107 : vector<8xf32> to vector<8x1xf32>
    %109 = arith.addf %106, %108 : vector<8x1xf32>
    %c1_55 = arith.constant 1 : index
    %c0_56 = arith.constant 0 : index
    %c0_57 = arith.constant 0 : index
    %110 = vector.load %arg14[%c1_55, %c0_56, %c0_57] : memref<2x8x1xf32, #tpu.memory_space<vmem>>, vector<1x8x1xf32>
    %111 = vector.shape_cast %110 : vector<1x8x1xf32> to vector<8x1xf32>
    %112 = vector.shape_cast %109 : vector<8x1xf32> to vector<1x8x1xf32>
    tpu.vector_store %arg14[%c1_55, %c0_56, %c0_57], %112 {strides = array<i32>} : memref<2x8x1xf32, #tpu.memory_space<vmem>>, vector<1x8x1xf32>,
    %c1_58 = arith.constant 1 : index
    %c0_59 = arith.constant 0 : index
    %c0_60 = arith.constant 0 : index
    %113 = vector.load %arg15[%c1_58, %c0_59, %c0_60] : memref<2x8x8xf32, #tpu.memory_space<vmem>>, vector<1x8x8xf32>
    %114 = vector.shape_cast %113 : vector<1x8x8xf32> to vector<8x8xf32>
    %115 = vector.broadcast %100 : vector<8x1xf32> to vector<8x8xf32>
    %116 = arith.mulf %115, %114 : vector<8x8xf32>
    %117 = arith.truncf %103 : vector<8x8xf32> to vector<8x8xbf16>
    %cst_61 = arith.constant dense<0.000000e+00> : vector<8x8xf32>
    %118 = tpu.matmul %117, %92, %cst_61 {dimension_numbers = #tpu.dot_dimension_numbers<[1], [0], [0], [1], [0, 0, 1, 1], [], []>} : vector<8x8xbf16>, vector<8x8xbf16>, vector<8x8xf32> -> vector<8x8xf32>
    %119 = arith.addf %116, %118 : vector<8x8xf32>
    %c1_62 = arith.constant 1 : index
    %c0_63 = arith.constant 0 : index
    %c0_64 = arith.constant 0 : index
    %120 = vector.load %arg15[%c1_62, %c0_63, %c0_64] : memref<2x8x8xf32, #tpu.memory_space<vmem>>, vector<1x8x8xf32>
    %121 = vector.shape_cast %120 : vector<1x8x8xf32> to vector<8x8xf32>
    %122 = vector.shape_cast %119 : vector<8x8xf32> to vector<1x8x8xf32>
    tpu.vector_store %arg15[%c1_62, %c0_63, %c0_64], %122 {strides = array<i32>} : memref<2x8x8xf32, #tpu.memory_space<vmem>>, vector<1x8x8xf32>,
    %c1_65 = arith.constant 1 : index
    %c0_66 = arith.constant 0 : index
    %c0_67 = arith.constant 0 : index
    %123 = vector.load %arg13[%c1_65, %c0_66, %c0_67] : memref<2x8x1xf32, #tpu.memory_space<vmem>>, vector<1x8x1xf32>
    %124 = vector.shape_cast %123 : vector<1x8x1xf32> to vector<8x1xf32>
    %125 = vector.shape_cast %98 : vector<8x1xf32> to vector<1x8x1xf32>
    tpu.vector_store %arg13[%c1_65, %c0_66, %c0_67], %125 {strides = array<i32>} : memref<2x8x1xf32, #tpu.memory_space<vmem>>, vector<1x8x1xf32>,
    %c0_i32_68 = arith.constant 0 : i32
    %126 = arith.cmpi eq, %arg2, %c0_i32_68 : i32
    %127 = arith.extui %126 : i1 to i32
    %c0_i32_69 = arith.constant 0 : i32
    %128 = arith.cmpi ne, %127, %c0_i32_69 : i32
    scf.if %128 {
      %c0_70 = arith.constant 0 : index
      %c0_71 = arith.constant 0 : index
      %c0_72 = arith.constant 0 : index
      %129 = vector.load %arg15[%c0_70, %c0_71, %c0_72] : memref<2x8x8xf32, #tpu.memory_space<vmem>>, vector<1x8x8xf32>
      %130 = vector.shape_cast %129 : vector<1x8x8xf32> to vector<8x8xf32>
      %c0_73 = arith.constant 0 : index
      %c0_74 = arith.constant 0 : index
      %c0_75 = arith.constant 0 : index
      %131 = vector.load %arg14[%c0_73, %c0_74, %c0_75] : memref<2x8x1xf32, #tpu.memory_space<vmem>>, vector<1x8x1xf32>
      %132 = vector.shape_cast %131 : vector<1x8x1xf32> to vector<8x1xf32>
      %133 = tpu.reciprocal %132 {approx = true} : vector<8x1xf32> -> vector<8x1xf32>
      %134 = vector.broadcast %133 : vector<8x1xf32> to vector<8x8xf32>
      %135 = arith.mulf %130, %134 : vector<8x8xf32>
      %c1_76 = arith.constant 1 : index
      %c0_77 = arith.constant 0 : index
      %c0_78 = arith.constant 0 : index
      %136 = vector.load %arg15[%c1_76, %c0_77, %c0_78] : memref<2x8x8xf32, #tpu.memory_space<vmem>>, vector<1x8x8xf32>
      %137 = vector.shape_cast %136 : vector<1x8x8xf32> to vector<8x8xf32>
      %c1_79 = arith.constant 1 : index
      %c0_80 = arith.constant 0 : index
      %c0_81 = arith.constant 0 : index
      %138 = vector.load %arg14[%c1_79, %c0_80, %c0_81] : memref<2x8x1xf32, #tpu.memory_space<vmem>>, vector<1x8x1xf32>
      %139 = vector.shape_cast %138 : vector<1x8x1xf32> to vector<8x1xf32>
      %140 = tpu.reciprocal %139 {approx = true} : vector<8x1xf32> -> vector<8x1xf32>
      %141 = vector.broadcast %140 : vector<8x1xf32> to vector<8x8xf32>
      %142 = arith.mulf %137, %141 : vector<8x8xf32>
      %143 = tpu.concatenate %135, %142 in 1 : vector<8x8xf32>, vector<8x8xf32> -> vector<8x16xf32>
      %cst_82 = arith.constant dense<0.000000e+00> : vector<8xf32>
      %144 = vector.multi_reduction <add>, %143, %cst_82 [1] : vector<8x16xf32> to vector<8xf32>
      %145 = vector.shape_cast %144 : vector<8xf32> to vector<8x1xf32>
      %cst_83 = arith.constant 1.600000e+01 : f32
      %146 = vector.broadcast %cst_83 : f32 to vector<8x1xf32>
      %147 = arith.divf %145, %146 : vector<8x1xf32>
      %148 = vector.broadcast %147 : vector<8x1xf32> to vector<8x16xf32>
      %149 = arith.subf %143, %148 : vector<8x16xf32>
      %150 = arith.mulf %149, %149 : vector<8x16xf32>
      %cst_84 = arith.constant dense<0.000000e+00> : vector<8xf32>
      %151 = vector.multi_reduction <add>, %150, %cst_84 [1] : vector<8x16xf32> to vector<8xf32>
      %152 = vector.shape_cast %151 : vector<8xf32> to vector<8x1xf32>
      %cst_85 = arith.constant 1.600000e+01 : f32
      %153 = vector.broadcast %cst_85 : f32 to vector<8x1xf32>
      %154 = arith.divf %152, %153 : vector<8x1xf32>
      %155 = vector.broadcast %147 : vector<8x1xf32> to vector<8x16xf32>
      %156 = arith.subf %143, %155 : vector<8x16xf32>
      %cst_86 = arith.constant 9.99999974E-6 : f32
      %157 = vector.broadcast %cst_86 : f32 to vector<8x1xf32>
      %158 = arith.addf %154, %157 : vector<8x1xf32>
      %159 = math.rsqrt %158 : vector<8x1xf32>
      %160 = vector.broadcast %159 : vector<8x1xf32> to vector<8x16xf32>
      %161 = arith.mulf %156, %160 : vector<8x16xf32>
      %c0_87 = arith.constant 0 : index
      %c0_88 = arith.constant 0 : index
      %162 = vector.load %arg9[%c0_87, %c0_88] : memref<2x16xf32, #tpu.memory_space<vmem>>, vector<2x16xf32>
      %163 = vector.extract_strided_slice %162 {offsets = [0, 0], sizes = [1, 16], strides = [1, 1]} : vector<2x16xf32> to vector<1x16xf32>
      %164 = vector.broadcast %163 : vector<1x16xf32> to vector<8x16xf32>
      %165 = arith.mulf %161, %164 : vector<8x16xf32>
      %166 = vector.extract_strided_slice %162 {offsets = [1, 0], sizes = [1, 16], strides = [1, 1]} : vector<2x16xf32> to vector<1x16xf32>
      %167 = vector.broadcast %166 : vector<1x16xf32> to vector<8x16xf32>
      %168 = arith.addf %165, %167 : vector<8x16xf32>
      %169 = arith.mulf %168, %168 : vector<8x16xf32>
      %cst_89 = arith.constant dense<0.000000e+00> : vector<8xf32>
      %170 = vector.multi_reduction <add>, %169, %cst_89 [1] : vector<8x16xf32> to vector<8xf32>
      %171 = vector.shape_cast %170 : vector<8xf32> to vector<8x1xf32>
      %cst_90 = arith.constant 1.600000e+01 : f32
      %172 = vector.broadcast %cst_90 : f32 to vector<8x1xf32>
      %173 = arith.divf %171, %172 : vector<8x1xf32>
      %cst_91 = arith.constant 9.99999997E-7 : f32
      %174 = vector.broadcast %cst_91 : f32 to vector<8x1xf32>
      %175 = arith.addf %173, %174 : vector<8x1xf32>
      %176 = math.rsqrt %175 : vector<8x1xf32>
      %177 = vector.broadcast %176 : vector<8x1xf32> to vector<8x16xf32>
      %178 = arith.mulf %168, %177 : vector<8x16xf32>
      %179 = math.absf %178 : vector<8x16xf32>
      %cst_92 = arith.constant dense<0xFF800000> : vector<8xf32>
      %180 = vector.multi_reduction <maximumf>, %179, %cst_92 [1] : vector<8x16xf32> to vector<8xf32>
      %181 = vector.shape_cast %180 : vector<8xf32> to vector<8x1xf32>
      %cst_93 = arith.constant 9.99999974E-6 : f32
      %182 = vector.broadcast %cst_93 : f32 to vector<8x1xf32>
      %183 = arith.maximumf %181, %182 : vector<8x1xf32>
      %cst_94 = arith.constant 1.270000e+02 : f32
      %184 = vector.broadcast %cst_94 : f32 to vector<8x1xf32>
      %185 = arith.divf %184, %183 : vector<8x1xf32>
      %186 = vector.broadcast %185 : vector<8x1xf32> to vector<8x16xf32>
      %187 = arith.mulf %178, %186 : vector<8x16xf32>
      %188 = math.roundeven %187 : vector<8x16xf32>
      %cst_95 = arith.constant -1.280000e+02 : f32
      %cst_96 = arith.constant 1.270000e+02 : f32
      %189 = vector.broadcast %cst_95 : f32 to vector<8x16xf32>
      %190 = arith.maximumf %189, %188 : vector<8x16xf32>
      %191 = vector.broadcast %cst_96 : f32 to vector<8x16xf32>
      %192 = arith.minimumf %191, %190 : vector<8x16xf32>
      %cst_97 = arith.constant 0.00787401571 : f32
      %193 = vector.broadcast %cst_97 : f32 to vector<8x1xf32>
      %194 = arith.mulf %183, %193 : vector<8x1xf32>
      %195 = arith.truncf %192 : vector<8x16xf32> to vector<8x16xbf16>
      %c0_98 = arith.constant 0 : index
      %c0_99 = arith.constant 0 : index
      %196 = vector.load %arg8[%c0_98, %c0_99] : memref<16x32xbf16, #tpu.memory_space<vmem>>, vector<16x32xbf16>
      %cst_100 = arith.constant dense<0.000000e+00> : vector<8x32xf32>
      %197 = tpu.matmul %195, %196, %cst_100 {dimension_numbers = #tpu.dot_dimension_numbers<[1], [0], [0], [1], [0, 0, 1, 1], [], []>} : vector<8x16xbf16>, vector<16x32xbf16>, vector<8x32xf32> -> vector<8x32xf32>
      %198 = vector.broadcast %2 : f32 to vector<8x1xf32>
      %199 = arith.mulf %194, %198 : vector<8x1xf32>
      %200 = vector.broadcast %199 : vector<8x1xf32> to vector<8x32xf32>
      %201 = arith.mulf %197, %200 : vector<8x32xf32>
      %c0_101 = arith.constant 0 : index
      %c0_102 = arith.constant 0 : index
      %c0_103 = arith.constant 0 : index
      %202 = vector.load %arg11[%c0_101, %c0_102, %c0_103] : memref<1x8x32xf32, #tpu.memory_space<vmem>>, vector<1x8x32xf32>
      %203 = vector.shape_cast %202 : vector<1x8x32xf32> to vector<8x32xf32>
      %204 = vector.shape_cast %201 : vector<8x32xf32> to vector<1x8x32xf32>
      tpu.vector_store %arg11[%c0_101, %c0_102, %c0_103], %204 {strides = array<i32>} : memref<1x8x32xf32, #tpu.memory_space<vmem>>, vector<1x8x32xf32>,
    } else {
    }
    return
  }
  func.func @transform_0(%arg0: i32, %arg1: i32, %arg2: i32) -> (i32, i32, i32) {
    %c0_i32 = arith.constant 0 : i32
    %c0_i32_0 = arith.constant 0 : i32
    return %arg0, %arg1, %c0_i32 : i32, i32, i32
  }
  func.func @transform_1(%arg0: i32, %arg1: i32, %arg2: i32) -> (i32, i32, i32) {
    %c0_i32 = arith.constant 0 : i32
    %c0_i32_0 = arith.constant 0 : i32
    return %arg0, %arg2, %c0_i32 : i32, i32, i32
  }
  func.func @transform_2(%arg0: i32, %arg1: i32, %arg2: i32) -> (i32, i32) {
    %c0_i32 = arith.constant 0 : i32
    %c0_i32_0 = arith.constant 0 : i32
    %c0_i32_1 = arith.constant 0 : i32
    return %c0_i32, %c0_i32_0 : i32, i32
  }
  func.func @transform_3(%arg0: i32, %arg1: i32, %arg2: i32) -> (i32, i32) {
    %c0_i32 = arith.constant 0 : i32
    %c0_i32_0 = arith.constant 0 : i32
    %c0_i32_1 = arith.constant 0 : i32
    return %c0_i32, %c0_i32_0 : i32, i32
  }
  func.func @transform_4(%arg0: i32, %arg1: i32, %arg2: i32) -> (i32, i32) {
    %c0_i32 = arith.constant 0 : i32
    %c0_i32_0 = arith.constant 0 : i32
    %c0_i32_1 = arith.constant 0 : i32
    return %c0_i32, %c0_i32_0 : i32, i32
  }
  func.func @transform_5(%arg0: i32, %arg1: i32, %arg2: i32) -> (i32, i32) {
    %c0_i32 = arith.constant 0 : i32
    %c0_i32_0 = arith.constant 0 : i32
    %c0_i32_1 = arith.constant 0 : i32
    return %c0_i32, %c0_i32_0 : i32, i32
  }
  func.func @transform_6(%arg0: i32, %arg1: i32, %arg2: i32) -> (i32, i32) {
    %c0_i32 = arith.constant 0 : i32
    %c0_i32_0 = arith.constant 0 : i32
    %c0_i32_1 = arith.constant 0 : i32
    return %c0_i32, %c0_i32_0 : i32, i32
  }
  func.func @transform_7(%arg0: i32, %arg1: i32, %arg2: i32) -> i32 {
    %c0_i32 = arith.constant 0 : i32
    %c0_i32_0 = arith.constant 0 : i32
    return %c0_i32 : i32
  }
  func.func @transform_8(%arg0: i32, %arg1: i32, %arg2: i32) -> (i32, i32, i32) {
    %c0_i32 = arith.constant 0 : i32
    %c0_i32_0 = arith.constant 0 : i32
    return %arg0, %arg1, %c0_i32 : i32, i32, i32
  }
}

</mosaic_0001>

<bundles_post_ra>
// kernel: tpu_custom_call.1
= control target key start
LH: loop header
LB: loop body
LE: loop exit
PB: predicated region body
PF: predicated region fallthrough
CT: control target
= control target key end

     0   :  { %13 = vsyncpa [#allocation8], 0  ;;  %s1726_s0 = inlined_call_operand.vmem [shape: f32[2,8,32], index: 0, kind: input, shape index: {}]   ;;  %s1727_s1 = inlined_call_operand.vmem [shape: f32[2,8,32], index: 1, kind: input, shape index: {}]   ;;  %s1728_s2 = inlined_call_operand.vmem [shape: s8[32,16], index: 2, kind: input, shape index: {}]   ;;  %s1729_s3 = inlined_call_operand.vmem [shape: s8[32,16], index: 3, kind: input, shape index: {}]   ;;  %s1730_s4 = inlined_call_operand.vmem [shape: s8[32,16], index: 4, kind: input, shape index: {}]   ;;  %s1731_s5 = inlined_call_operand.vmem [shape: s8[16,32], index: 5, kind: input, shape index: {}]   ;;  %s1732_s6 = inlined_call_operand.vmem [shape: f32[2,16], index: 6, kind: input, shape index: {}]   ;;  %s1733_s7 = inlined_call_operand.vmem [shape: f32[4], index: 7, kind: input, shape index: {}]   ;;  %s1734_s8 = inlined_call_operand.hbm [shape: f32[2,8,32], index: 8, kind: output, shape index: {}]  }
   0x1   :  { %14 = vsyncpa [#allocation7], 0 }
   0x2   :  { %16 = vsyncpa [#allocation7 + $0x1], 0  ;;  %s1498_s27 = smov 0   ;;  %s1500_s28 = smov 0  }
   0x3   :  { %s1502_s29 = smov 0   ;;  %s1504_s30 = smov 0  }
   0x4   :  { %s1506_s9 = smov 0   ;;  %s1508_s10 = smov 0  }
   0x5 LB: > { %s1137_s11 = sadd.s32 4294967295, %s1443_s10   ;;  %s1138_s12 = sadd.s32 4294967294, %s1443_s10   ;;  %s1443_s10 = sphi %s1508_s10, %s22_s10   ;;  %s1439_s9 = sphi %s1506_s9, %s1743_s9   ;;  %s1435_s30 = sphi %s1504_s30, %s1742_s30   ;;  %s1431_s29 = sphi %s1502_s29, %s1741_s29   ;;  %s1427_s28 = sphi %s1500_s28, %s1740_s28   ;;  %s1423_s27 = sphi %s1498_s27, %s1739_s27  }
   0x6   : > { %s41_s13 = sadd.s32 1, %s1439_s9  ;;  %s232_s14 = sadd.s32 1, %s1431_s29 }
   0x7   : > { %p43_p0 = scmp.ge.s32.totalorder %s41_s13, 2  ;;  %p242_p1 = scmp.ne.s32.totalorder %s1431_s29, %s1427_s28 }
   0x8   : > { %p243_p2 = scmp.eq.s32.totalorder %s1137_s11, 1  ;;  %p248_p3 = scmp.ne.s32.totalorder %s1427_s28, %s1423_s27 }
   0x9   : > { %s1745_s13 = smov (%p43_p0, %s41_s13), 0  ;;  %p249_p5 = scmp.eq.s32.totalorder %s1138_s12, 1 }
   0xa   : > { %p1538_p4 = por %p243_p2, %p242_p1  ;;  %s227_s16 = ssub.s32 %s1439_s9, %s1745_s13 }
   0xb   : > { %p1139_p6 = scmp.ge.s32.totalorder %s1443_s10, 1  ;;  %p230_p7 = scmp.eq.s32.totalorder %s227_s16, 0 }
   0xc   : > { %p1545_p8 = por %p249_p5, %p248_p3  ;;  %p256_p9 = scmp.lt.s32.totalorder %s1443_s10, 3 }
   0xd   : > { %s1551_s18 = scalar_select %p230_p7, %s1431_s29, %s232_s14  }
   0xe   : > { %p1553_p10 = pnand %p1139_p6, %p256_p9  ;;  %p1557_p11 = scmp.eq.s32.totalorder %s1137_s11, 0 }
   0xf   : > { %s284_s23 = sshll.u32 %s1733_s7, 4  ;;  %s285_s23 = int_to_ptr.vmem [resolvable:$true] %s284_s23 }
  0x10   : > { %p1252_p12 = pneg %p1553_p10  ;;  %s1346_s24 = scalar_lea.vmem %s285_s23, 16 }
  0x11   : > { %p1347_p0 = scmp.ne.s32.totalorder %s285_s23, %s1346_s24  ;;  %p1354_p5 = scmp.lt.s32.totalorder %s285_s23, %s285_s23 }
  0x12   : > { %p1253_p13 = pnand %p1557_p11, %p1252_p12  ;;  %p1355_p6 = scmp.lt.s32.totalorder %s1346_s24, %s1346_s24 }
  0x14   : > { %p1348_p1 = pneg %p1253_p13  ;;  %p1356_p7 = por %p1355_p6, %p1354_p5 }
  0x16   : > { %p1349_p2 = pnand %p1348_p1, %p1347_p0 }
  0x18   : > { %p1350_p3 = pneg %p1349_p2 }
  0x1a   : > { %p1357_p9 = pnand %p1356_p7, %p1350_p3 }
  0x1c   : > { %1360 = shalt.err (!%p1357_p9)
}
  0x1d   : > { %s1445_s25 = smov [#allocation6]   ;;  %317 = sbr.rel (%p1553_p10) target bundleno = 2528 (0x9e0), region = 52 }
  0x1e   : > { %1255 = dma.vmem_to_smem (!%p1253_p13), %s285_s23, 16, %s1445_s25, [#allocation8]  }
  0x24   : > { %1414 = dma.done.wait (%p1557_p11), [#allocation8], 16  }
  0x25   : > { %1416 = vsyncadd (%p1557_p11), [#allocation8], 4294967280 }
  0x26   : > { %323 = sfence }
  0x27   : > { %p361_p12 = scmp.lt.s32.totalorder %s1435_s30, 1  ;;  %vm385_vm0 = vcmask 261120   ;;  %v413_v20 = vld [vmem:[%s1728_s2] sm:$0xff]  ;;  %v1446_v22 = vmov 0.0   ;;  %vm1447_vm1 = vmmov 0   ;;  %vm467_vm2 = vcmask 64512  }
  0x28   : > { %v415_v21 = vunpack.c.l.s8.bf16 %v413_v20  ;;  %1181 = vmatprep.subr.bf16.mxu0 %v1446_v22  ;;  %1189 = vmatprep.subr.bf16.mxu1 %v1446_v22  ;;  %v416_v23 = vunpack.c.h.s8.bf16 %v413_v20  ;;  %v512_v24 = vld [vmem:[%s1729_s3] sm:$0xff]  ;;  %480 = vst.msk [vmem:[#allocation5] sm:$0xff] %vm467_vm2, %v1446_v22  ;;  %481 = vst.msk [vmem:[#allocation5 + $0x8] sm:$0xff] %vm467_vm2, %v1446_v22  ;;  %s376_s12 = sld [smem:[#allocation6]]  ;;  %s1448_s21 = smov 120   ;;  %vm697_vm3 = vcmask 1043456  }
  0x29   : > { %s362_s26 = scalar_select %p361_p12, %s1435_s30, 1  ;;  %v514_v25 = vunpack.c.l.s8.bf16 %v512_v24  ;;  %1185 = vmatprep.mubr.msk.bf16.mxu0 %vm1447_vm1, %v1446_v22  ;;  %1193 = vmatprep.mubr.msk.bf16.mxu1 %vm1447_vm1, %v1446_v22  ;;  %v515_v26 = vunpack.c.h.s8.bf16 %v512_v24  ;;  %v565_v45 = vld [vmem:[%s1730_s4] sm:$0xff]  ;;  %vm475_vm4 = vcmask 7168   ;;  %vm908_vm5 = vcmask 130048  }
  0x2a   : > { %1182 = vmatpush3.bf16.msra.mxu0 %v415_v21  ;;  %v566_v48 = vunpack.c.l.s8.bf16 %v565_v45  ;;  %v567_v52 = vunpack.c.h.s8.bf16 %v565_v45  ;;  %478 = vst.msk [vmem:[#allocation4] sm:$0xff] %vm475_vm4, %v1446_v22  ;;  %479 = vst.msk [vmem:[#allocation4 + $0x8] sm:$0xff] %vm475_vm4, %v1446_v22  ;;  %s1451_s22 = smov 8  }
  0x2b   : > { %s1145_s11 = sshll.u32 %s362_s26, 3  ;;  %1183 = vmatprep.subr.bf16.mxu0 %v1446_v22  ;;  %1190 = vmatpush3.bf16.msra.mxu1 %v514_v25 }
  0x2c   : > { %s367_s16 = scalar_lea.vmem %s1726_s0, %s1145_s11  ;;  %s374_s19 = scalar_lea.vmem %s1727_s1, %s1145_s11  ;;  %1191 = vmatprep.subr.bf16.mxu1 %v1446_v22 }
  0x2d   : > { %v383_v0 = vld [vmem:[%s367_s16] sm:$0xff]  ;;  %s1147_s16 = sld [smem:[#allocation6 + $0x1]]  ;;  %s1148_s11 = sld [smem:[#allocation6 + $0x3]] }
  0x2e   : > { %v482_v1 = vld [vmem:[%s374_s19] sm:$0xff]  ;;  %v384_v2 = vmul.f32 %v383_v0, %v383_v0  ;;  %1184 = vmatpush3.bf16.msra.mxu0 %v416_v23  ;;  %s463_s14 = smul.f32 0.125, %s376_s12  ;;  %s358_s12 = sand.u32 1, %s1427_s28  }
  0x2f   : > { %v483_v3 = vmul.f32 %v482_v1, %v482_v1  ;;  %1197 = vmatprep.subr.bf16.mxu0 %v1446_v22  ;;  %1192 = vmatpush3.bf16.msra.mxu1 %v515_v26  ;;  %s1022_s24 = scalar_lea.sflag [#allocation7], %s358_s12 }
  0x30   : > { %v386_v4 = vsel %vm385_vm0, %v384_v2, 0.0  ;;  %1205 = vmatprep.subr.bf16.mxu1 %v1446_v22  ;;  %v464_v58 = vstv %s463_s14  ;;  %s1144_s14 = sshll.u32 %s358_s12, 3 }
  0x31   : > { %387 = vadd.xlane.f32.xlu0 %v386_v4  ;;  %v485_v5 = vsel %vm385_vm0, %v483_v3, 0.0 }
  0x33   : > { %v562_v4 = vstv %s1147_s16  ;;  %s1159_s16 = sshll.u32 %s1435_s30, 7  ;;  %s1452_s30 = smov [#allocation9]  }
  0x34   : > { %s1678_s23 = scalar_lea.hbm %s1734_s8, %s1159_s16  ;;  %s1365_s26 = sshll.u32 %s1452_s30, 4  ;;  %s1366_s26 = int_to_ptr.vmem [resolvable:$false] %s1365_s26 }
  0x35   : > { %486 = vadd.xlane.f32.xlu0 %v485_v5 }
  0xbe   : > { %v388_v6 = vpop.xlane.xlu0 %387 }
  0xbf   : > { %v390_v7 = vmul.f32 0.03125, %v388_v6 }
  0xc1   : > { %v391_v8 = vadd.f32 1e-06, %v390_v7 }
  0xc2   : > { %v487_v9 = vpop.xlane.xlu0 %486 }
  0xc3   : > { %1320 = vrsqrt.f32 %v391_v8  ;;  %v489_v10 = vmul.f32 0.03125, %v487_v9 }
  0xc5   : > { %v490_v11 = vadd.f32 1e-06, %v489_v10 }
  0xc7   : > { %1322 = vrsqrt.f32 %v490_v11 }
  0xcd   : > { %v1321_v12 = vpop.eup %1320 }
  0xce   : > { %v393_v13 = vmul.f32 %v1321_v12, %v383_v0 }
  0xd0   : > { %v394_v14 = vand.u32 2147483647, %v393_v13 }
  0xd1   : > { %v1323_v15 = vpop.eup %1322 }
  0xd2   : > { %v395_v16 = vsel %vm385_vm0, %v394_v14, -inf  ;;  %v492_v17 = vmul.f32 %v1323_v15, %v482_v1 }
  0xd3   : > { %396 = vmax.xlane.f32.xlu1 %v395_v16 }
  0xd4   : > { %v493_v18 = vand.u32 2147483647, %v492_v17 }
  0xd6   : > { %v494_v19 = vsel %vm385_vm0, %v493_v18, -inf }
  0xd7   : > { %495 = vmax.xlane.f32.xlu1 %v494_v19 }
 0x160   : > { %v397_v27 = vpop.xlane.xlu1 %396 }
 0x161   : > { %v398_v28 = vmax.f32 %v397_v27, 1e-05 }
 0x163   : > { %1324 = vrcp.f32 %v398_v28  ;;  %v405_v55 = vmul.f32 0.007874016, %v398_v28 }
 0x164   : > { %v496_v29 = vpop.xlane.xlu1 %495 }
 0x165   : > { %v497_v30 = vmax.f32 %v496_v29, 1e-05  ;;  %v465_v63 = vmul.f32 %v464_v58, %v405_v55 }
 0x167   : > { %1326 = vrcp.f32 %v497_v30  ;;  %v504_v0 = vmul.f32 0.007874016, %v497_v30 }
 0x169   : > { %v563_v10 = vmul.f32 %v562_v4, %v504_v0 }
 0x16d   : > { %v1325_v31 = vpop.eup %1324 }
 0x16e   : > { %v400_v32 = vmul.f32 127.0, %v1325_v31 }
 0x170   : > { %v401_v33 = vmul.f32 %v400_v32, %v393_v13  ;;  %v1449_v32 = vmov -inf  }
 0x171   : > { %v1327_v34 = vpop.eup %1326  ;;  %476 = vst.msk [vmem:[#allocation3] sm:$0xff] %vm475_vm4, %v1449_v32  ;;  %477 = vst.msk [vmem:[#allocation3 + $0x8] sm:$0xff] %vm475_vm4, %v1449_v32 }
 0x172   : > { %v1235_v35 = vround.rtne.f32 %v401_v33  ;;  %v499_v36 = vmul.f32 127.0, %v1327_v34 }
 0x174   : > { %v403_v37 = vmax.f32 %v1235_v35, -128.0  ;;  %v500_v38 = vmul.f32 %v499_v36, %v492_v17 }
 0x176   : > { %v404_v39 = vmin.f32 %v403_v37, 127.0  ;;  %v1238_v40 = vround.rtne.f32 %v500_v38  ;;  %v1450_v38 = vmov 0  }
 0x177   : > { %1318 = vset.pattern.permute.xlu0 %v1450_v38  ;;  %1319 = vset.pattern.permute.xlu1 %v1450_v38 }
 0x178   : > { %v502_v41 = vmax.f32 %v1238_v40, -128.0  ;;  %v406_v42 = vtrunc.f32 %v404_v39 }
 0x17a   : > { %v503_v43 = vmin.f32 %v502_v41, 127.0  ;;  %v407_v44 = vpack.c.f32.eXmY %v406_v42, %v406_v42, 312 }
 0x17c   : > { %v411_v46 = vpack.c.b8 %v407_v44, %v407_v44  ;;  %v505_v47 = vtrunc.f32 %v503_v43  ;;  %v662_v44 = vld [vmem:[#allocation3] sm:$0xff] }
 0x17e   : > { %v414_v49 = vunpack.c.l.s8.bf16 %v411_v46  ;;  %v506_v50 = vpack.c.f32.eXmY %v505_v47, %v505_v47, 312 }
 0x180   : > { %1186 = vmatmul.mubr.msk.bf16.vlgmr.msra.gmra.mrb[0].mxu0 %vm385_vm0, %v414_v49  ;;  %v510_v51 = vpack.c.b8 %v506_v50, %v506_v50 }
 0x181   : > { %1198 = vmatpush3.bf16.msra.mxu0 %v566_v48  ;;  %1201 = vmatprep.mubr.msk.bf16.mxu0 %vm1447_vm1, %v1446_v22  ;;  %v797_v48 = vld [vmem:[#allocation3 + $0x8] sm:$0xff] }
 0x182   : > { %v513_v53 = vunpack.c.l.s8.bf16 %v510_v51  ;;  %1199 = vmatprep.subr.bf16.mxu0 %v1446_v22 }
 0x184   : > { %1194 = vmatmul.mubr.msk.bf16.vlgmr.msra.gmra.mrb[0].mxu1 %vm385_vm0, %v513_v53 }
 0x185   : > { %1200 = vmatpush3.bf16.msra.mxu0 %v567_v52  ;;  %1207 = vmatprep.mubr.msk.bf16.mxu1 %vm1447_vm1, %v1446_v22 }
 0x186   : > { %1211 = vmatprep.subr.bf16.mxu0 %v1446_v22 }
 0x188   : > { %1202 = vmatmul.mubr.msk.bf16.vlgmr.msra.gmra.mrb[4].mxu0 %vm385_vm0, %v513_v53 }
 0x189   : > { %1213 = vmatprep.mubr.msk.bf16.mxu0 %vm1447_vm1, %v1446_v22 }
 0x253   : > { %v455_v54 = vpop.f32.mrb[0].mxu0 }
 0x254   : > { %v1236_v56 = vtrunc.f32 %v455_v54  ;;  %v1187_v57 = vpop.f32.mrb[1].mxu0 }
 0x255   : > { %v458_v59 = vpop.f32.mrb[2].mxu0 }
 0x256   : > { %v1237_v60 = vcvt.f32.s32 %v1236_v56  ;;  %v1188_v61 = vpop.f32.mrb[3].mxu0 }
 0x257   : > { %v554_v62 = vpop.f32.mrb[0].mxu1 }
 0x258   : > { %v462_v1 = vcvt.s32.f32 %v1237_v60  ;;  %v1239_v2 = vtrunc.f32 %v554_v62  ;;  %v1195_v3 = vpop.f32.mrb[1].mxu1 }
 0x259   : > { %v557_v5 = vpop.f32.mrb[2].mxu1 }
 0x25a   : > { %v466_v6 = vmul.f32 %v465_v63, %v462_v1  ;;  %v1240_v7 = vcvt.f32.s32 %v1239_v2  ;;  %v1196_v8 = vpop.f32.mrb[3].mxu1  ;;  %v678_v5 = vld [vmem:[#allocation4] sm:$0xff] }
 0x25b   : > { %v602_v9 = vpop.f32.mrb[4].mxu0 }
 0x25c   : > { %468 = vst.msk [vmem:[#allocation2] sm:$0xff] %vm467_vm2, %v466_v6  ;;  %v561_v11 = vcvt.s32.f32 %v1240_v7  ;;  %v1241_v12 = vtrunc.f32 %v602_v9  ;;  %470 = vrot.lane.b32.xlu0 %v466_v6, %s1448_s21  ;;  %v1203_v13 = vpop.f32.mrb[5].mxu0  ;;  %v686_v9 = vld [vmem:[#allocation5] sm:$0xff] }
 0x25d   : > { %v605_v14 = vpop.f32.mrb[6].mxu0 }
 0x25e   : > { %v564_v15 = vmul.f32 %v563_v10, %v561_v11  ;;  %v1242_v16 = vcvt.f32.s32 %v1241_v12  ;;  %v1204_v17 = vpop.f32.mrb[7].mxu0 }
 0x25f   : > { %v814_v17 = vld [vmem:[#allocation4 + $0x8] sm:$0xff] }
 0x260   : > { %v609_v18 = vcvt.s32.f32 %v1242_v16  ;;  %v613_v19 = vpack.c.bf16 %v564_v15, %v564_v15 }
 0x262   : > { %v610_v20 = vmul.f32 %v609_v18, %v504_v0  ;;  %748 = vrot.lane.b32.xlu1 %v613_v19, %s1448_s21  ;;  %v620_v21 = vsel %vm467_vm2, %v613_v19, 0 }
 0x263   : > { %1206 = vmatpush3.bf16.xpose.msra.mxu1 %v620_v21  ;;  %v611_v24 = vld [vmem:[#allocation2] sm:$0xff] }
 0x264   : > { %v614_v23 = vpack.c.bf16 %v610_v20, %v610_v20  ;;  %1217 = vmatprep.subr.bf16.mxu1 %v1446_v22  ;;  %v612_v26 = vpack.c.bf16 %v611_v24, %v611_v24 }
 0x266   : > { %v699_v25 = vsel %vm697_vm3, %v614_v23, 0 }
 0x267   : > { %1212 = vmatpush3.bf16.msra.mxu0 %v699_v25 }
 0x268   : > { %1223 = vmatprep.subr.bf16.mxu0 %v1446_v22 }
 0x26a   : > { %1208 = vmatmul.mubr.msk.bf16.vlgmr.msra.gmra.mrb[4].mxu1 %vm467_vm2, %v612_v26  ;;  %v822_v26 = vld [vmem:[#allocation5 + $0x8] sm:$0xff] }
 0x26b   : > { %1219 = vmatprep.mubr.msk.bf16.mxu1 %vm1447_vm1, %v1446_v22 }
 0x2ce   : > { %v471_v27 = vpop.permute.xlu0 %470 }
 0x2cf   : > { %474 = vst.msk [vmem:[#allocation2 + $0x8] sm:$0xff] %vm467_vm2, %v471_v27 }
 0x2d4   : > { %v749_v28 = vpop.permute.xlu1 %748 }
 0x2d5   : > { %v754_v29 = vsel %vm467_vm2, %v749_v28, 0 }
 0x2d6   : > { %1218 = vmatpush3.bf16.xpose.msra.mxu1 %v754_v29  ;;  %v745_v30 = vld [vmem:[#allocation2 + $0x8] sm:$0xff] }
 0x2d7   : > { %1229 = vmatprep.subr.bf16.mxu1 %v1446_v22  ;;  %v746_v31 = vpack.c.bf16 %v745_v30, %v745_v30 }
 0x2dd   : > { %1220 = vmatmul.mubr.msk.bf16.vlgmr.msra.gmra.mrb[8].mxu1 %vm467_vm2, %v746_v31 }
 0x2de   : > { %1231 = vmatprep.mubr.msk.bf16.mxu1 %vm1447_vm1, %v1446_v22 }
 0x33d   : > { %v656_v33 = vpop.f32.mrb[4].mxu1 }
 0x33e   : > { %v1209_v34 = vpop.f32.mrb[5].mxu1  ;;  %v663_v35 = vsel %vm467_vm2, %v656_v33, -inf }
 0x33f   : > { %664 = vmax.xlane.f32.xlu1 %v663_v35  ;;  %v659_v36 = vpop.f32.mrb[6].mxu1 }
 0x340   : > { %v1210_v37 = vpop.f32.mrb[7].mxu1 }
 0x3b0   : > { %v790_v39 = vpop.f32.mrb[8].mxu1 }
 0x3b1   : > { %v1221_v40 = vpop.f32.mrb[9].mxu1  ;;  %v798_v41 = vsel %vm467_vm2, %v790_v39, -inf }
 0x3b2   : > { %799 = vmax.xlane.f32.xlu0 %v798_v41  ;;  %v793_v42 = vpop.f32.mrb[10].mxu1 }
 0x3b3   : > { %v1222_v43 = vpop.f32.mrb[11].mxu1 }
 0x3cc   : > { %v665_v45 = vpop.xlane.xlu1 %664 }
 0x3cd   : > { %v666_v46 = vmax.f32 %v662_v44, %v665_v45 }
 0x3cf   : > { %v667_v47 = vsub.f32 %v662_v44, %v666_v46  ;;  %743 = vst.msk [vmem:[#allocation3] sm:$0xff] %vm475_vm4, %v666_v46  ;;  %672 = vperm.xlu0 %1318, %v666_v46  }
 0x3d1   : > { %v668_v58 = vmul.f32 1.442695, %v667_v47 }
 0x43f   : > { %v800_v49 = vpop.xlane.xlu0 %799 }
 0x440   : > { %v801_v50 = vmax.f32 %v797_v48, %v800_v49 }
 0x442   : > { %v802_v51 = vsub.f32 %v797_v48, %v801_v50  ;;  %881 = vst.msk [vmem:[#allocation3 + $0x8] sm:$0xff] %vm475_vm4, %v801_v50  ;;  %807 = vperm.xlu1 %1319, %v801_v50   ;;  %v924_v50 = vlaneseq }
 0x446   : > { %831 = vrot.lane.b32.xlu1 %v614_v23, %s1448_s21  ;;  %s360_s21 = scalar_lea.vmem [#allocation9], %s1144_s14 }
 0x44e   : > { %v673_v52 = vpop.permute.xlu0 %672 }
 0x44f   : > { %v675_v53 = vsub.f32 %v656_v33, %v673_v52  ;;  %v925_v52 = vshrl.u32 %v924_v50, 7 }
 0x451   : > { %v676_v54 = vmul.f32 1.442695, %v675_v53  ;;  %v926_v53 = vsub.s32 0, %v925_v52 }
 0x453   : > { %1328 = vpow2.f32 %v676_v54  ;;  %v923_v54 = vld [vmem:[%s1732_s6] sm:$0x3] }
 0x454   : > { %1330 = vpow2.f32 %v668_v58 }
 0x45d   : > { %v1329_v55 = vpop.eup %1328 }
 0x45e   : > { %v680_v56 = vsel %vm467_vm2, %v1329_v55, 0.0  ;;  %v693_v57 = vpack.c.bf16 %v1329_v55, %v1329_v55  ;;  %v1331_v59 = vpop.eup %1330  ;;  %v931_v55 = vsub.s32 1, %v925_v52 }
 0x45f   : > { %681 = vadd.xlane.f32.xlu0 %v680_v56  ;;  %v679_v6 = vmul.f32 %v1331_v59, %v678_v5  ;;  %v927_v56 = vrot.slane %v923_v54, %v926_v53 }
 0x460   : > { %1214 = vmatmul.mubr.msk.bf16.vlgmr.msra.gmra.mrb[8].mxu0 %vm467_vm2, %v693_v57 }
 0x461   : > { %1225 = vmatprep.mubr.msk.bf16.mxu0 %vm1447_vm1, %v1446_v22  ;;  %v803_v22 = vmul.f32 1.442695, %v802_v51 }
 0x475   : > { %689 = vperm.xlu0 %1318, %v1331_v59   ;;  %v932_v59 = vrot.slane %v923_v54, %v931_v55 }
 0x4c1   : > { %v808_v60 = vpop.permute.xlu1 %807 }
 0x4c2   : > { %v810_v61 = vsub.f32 %v790_v39, %v808_v60 }
 0x4c4   : > { %v811_v62 = vmul.f32 1.442695, %v810_v61 }
 0x4c5   : > { %v832_v63 = vpop.permute.xlu1 %831 }
 0x4c6   : > { %1332 = vpow2.f32 %v811_v62  ;;  %v837_v0 = vsel %vm697_vm3, %v832_v63, 0 }
 0x4c7   : > { %1224 = vmatpush3.bf16.msra.mxu0 %v837_v0  ;;  %1334 = vpow2.f32 %v803_v22 }
 0x4d0   : > { %v1333_v1 = vpop.eup %1332 }
 0x4d1   : > { %v816_v2 = vsel %vm467_vm2, %v1333_v1, 0.0  ;;  %v829_v3 = vpack.c.bf16 %v1333_v1, %v1333_v1  ;;  %v1335_v4 = vpop.eup %1334 }
 0x4d2   : > { %817 = vadd.xlane.f32.xlu1 %v816_v2  ;;  %v815_v18 = vmul.f32 %v1335_v4, %v814_v17 }
 0x4d3   : > { %1226 = vmatmul.mubr.msk.bf16.vlgmr.msra.gmra.mrb[12].mxu0 %vm467_vm2, %v829_v3 }
 0x4e3   : > { %825 = vperm.xlu1 %1319, %v1335_v4  }
 0x4ec   : > { %v682_v7 = vpop.xlane.xlu0 %681 }
 0x4ed   : > { %v683_v8 = vadd.f32 %v682_v7, %v679_v6  ;;  %v961_v6 = vld [vmem:[%s1731_s5] sm:$0x3]  ;;  %v962_v7 = vld [vmem:[%s1731_s5 + $0x2] sm:$0x3] }
 0x4ef   : > { %685 = vst.msk [vmem:[#allocation4] sm:$0xff] %vm475_vm4, %v683_v8  ;;  %v964_v8 = vunpack.c.l.s8.bf16 %v961_v6 }
 0x4f4   : > { %v690_v10 = vpop.permute.xlu0 %689 }
 0x4f5   : > { %v692_v11 = vmul.f32 %v690_v10, %v686_v9  ;;  %v965_v9 = vunpack.c.l.s8.bf16 %v962_v7 }
 0x4f6   : > { %v886_v23 = vld [vmem:[#allocation4] sm:$0xff] }
 0x4f7   : > { %v1156_v10 = vcombine.low %v964_v8, %v965_v9 }
 0x4f9   : > { %1230 = vmatpush3.bf16.msra.mxu1 %v1156_v10 }
 0x533   : > { %v735_v12 = vpop.f32.mrb[8].mxu0 }
 0x534   : > { %v741_v13 = vadd.f32 %v735_v12, %v692_v11  ;;  %v1215_v14 = vpop.f32.mrb[9].mxu0 }
 0x535   : > { %v738_v15 = vpop.f32.mrb[10].mxu0 }
 0x536   : > { %742 = vst.msk [vmem:[#allocation5] sm:$0xff] %vm467_vm2, %v741_v13  ;;  %v1216_v16 = vpop.f32.mrb[11].mxu0 }
 0x53d   : > { %v885_v38 = vld [vmem:[#allocation5] sm:$0xff] }
 0x55f   : > { %v818_v19 = vpop.xlane.xlu1 %817 }
 0x560   : > { %v819_v20 = vadd.f32 %v818_v19, %v815_v18 }
 0x562   : > { %820 = vst.msk [vmem:[#allocation4 + $0x8] sm:$0xff] %vm475_vm4, %v819_v20 }
 0x563   : > { %v826_v27 = vpop.permute.xlu1 %825 }
 0x564   : > { %v828_v28 = vmul.f32 %v826_v27, %v822_v26 }
 0x569   : > { %v895_v21 = vld [vmem:[#allocation4 + $0x8] sm:$0xff] }
 0x56a   : > { %1336 = vrcp.f32 %v895_v21 }
 0x56b   : > { %1338 = vrcp.f32 %v886_v23 }
 0x574   : > { %v1337_v24 = vpop.eup %1336 }
 0x575   : > { %899 = vperm.xlu1 %1319, %v1337_v24   ;;  %v1339_v25 = vpop.eup %1338 }
 0x579   : > { %890 = vperm.xlu1 %1319, %v1339_v25  }
 0x5a6   : > { %v873_v29 = vpop.f32.mrb[12].mxu0 }
 0x5a7   : > { %v879_v30 = vadd.f32 %v873_v29, %v828_v28  ;;  %v1227_v31 = vpop.f32.mrb[13].mxu0  ;;  %v1017_v28 = vstv %s1148_s11  ;;  %s1367_s11 = scalar_lea.vmem %s1366_s26, 256 }
 0x5a8   : > { %v876_v32 = vpop.f32.mrb[14].mxu0 }
 0x5a9   : > { %880 = vst.msk [vmem:[#allocation5 + $0x8] sm:$0xff] %vm467_vm2, %v879_v30  ;;  %v1228_v33 = vpop.f32.mrb[15].mxu0 }
 0x5b0   : > { %v894_v35 = vld [vmem:[#allocation5 + $0x8] sm:$0xff] }
 0x5f4   : > { %v900_v34 = vpop.permute.xlu1 %899 }
 0x5f5   : > { %v902_v36 = vmul.f32 %v900_v34, %v894_v35 }
 0x5f7   : > { %904 = vrot.lane.b32.xlu1 %v902_v36, %s1451_s22  ;;  %s1036_s22 = sshll.u32 %s360_s21, 4  ;;  %s1680_s22 = int_to_ptr.vmem [resolvable:$true] %s1036_s22 }
 0x5f8   : > { %v891_v37 = vpop.permute.xlu1 %890  ;;  %s1361_s25 = scalar_lea.vmem %s1680_s22, 128  ;;  %p1368_p0 = scmp.lt.s32.totalorder %s1680_s22, %s1366_s26 }
 0x5f9   : > { %v893_v39 = vmul.f32 %v891_v37, %v885_v38  ;;  %p1362_p10 = scmp.ne.s32.totalorder %s1680_s22, %s1361_s25  ;;  %p1369_p1 = scmp.lt.s32.totalorder %s1367_s11, %s1361_s25 }
 0x5fb   : > { %p1363_p11 = pnand %p1362_p10, %p1538_p4  ;;  %p1370_p2 = por %p1369_p1, %p1368_p0 }
 0x5fd   : > { %p1364_p13 = pneg %p1363_p11 }
 0x5ff   : > { %p1371_p3 = pnand %p1370_p2, %p1364_p13 }
 0x669   : > { %v905_v40 = vpop.permute.xlu1 %904 }
 0x66a   : > { %v907_v41 = vsel %vm467_vm2, %v893_v39, %v905_v40 }
 0x66b   : > { %v909_v42 = vsel %vm908_vm5, %v907_v41, 0.0 }
 0x66c   : > { %910 = vadd.xlane.f32.xlu1 %v909_v42 }
 0x6f9   : > { %v911_v43 = vpop.xlane.xlu1 %910 }
 0x6fa   : > { %v913_v44 = vmul.f32 0.0625, %v911_v43 }
 0x6fc   : > { %v914_v45 = vsub.f32 %v907_v41, %v913_v44 }
 0x6fe   : > { %v915_v46 = vmul.f32 %v914_v45, %v914_v45 }
 0x700   : > { %v916_v47 = vsel %vm908_vm5, %v915_v46, 0.0 }
 0x701   : > { %917 = vadd.xlane.f32.xlu0 %v916_v47 }
 0x78e   : > { %v918_v48 = vpop.xlane.xlu0 %917 }
 0x78f   : > { %v919_v49 = vmul.f32 0.0625, %v918_v48 }
 0x791   : > { %v920_v51 = vadd.f32 1e-05, %v919_v49 }
 0x793   : > { %1340 = vrsqrt.f32 %v920_v51 }
 0x79d   : > { %v1341_v57 = vpop.eup %1340 }
 0x79e   : > { %v922_v58 = vmul.f32 %v1341_v57, %v914_v45 }
 0x7a0   : > { %v928_v60 = vmul.f32 %v927_v56, %v922_v58 }
 0x7a2   : > { %v933_v61 = vadd.f32 %v932_v59, %v928_v60 }
 0x7a4   : > { %v934_v62 = vmul.f32 %v933_v61, %v933_v61 }
 0x7a6   : > { %v935_v63 = vsel %vm908_vm5, %v934_v62, 0.0 }
 0x7a7   : > { %936 = vadd.xlane.f32.xlu1 %v935_v63 }
 0x834   : > { %v937_v0 = vpop.xlane.xlu1 %936 }
 0x835   : > { %v938_v1 = vmul.f32 0.0625, %v937_v0 }
 0x837   : > { %v939_v2 = vadd.f32 1e-06, %v938_v1 }
 0x839   : > { %1342 = vrsqrt.f32 %v939_v2 }
 0x843   : > { %v1343_v3 = vpop.eup %1342 }
 0x844   : > { %v941_v22 = vmul.f32 %v1343_v3, %v933_v61 }
 0x846   : > { %v942_v4 = vand.u32 2147483647, %v941_v22 }
 0x848   : > { %v943_v5 = vsel %vm908_vm5, %v942_v4, -inf }
 0x849   : > { %944 = vmax.xlane.f32.xlu1 %v943_v5 }
 0x8d6   : > { %v945_v11 = vpop.xlane.xlu1 %944 }
 0x8d7   : > { %v946_v12 = vmax.f32 %v945_v11, 1e-05 }
 0x8d9   : > { %1344 = vrcp.f32 %v946_v12  ;;  %v953_v25 = vmul.f32 0.007874016, %v946_v12 }
 0x8db   : > { %v1018_v32 = vmul.f32 %v1017_v28, %v953_v25 }
 0x8e3   : > { %v1345_v13 = vpop.eup %1344 }
 0x8e4   : > { %v948_v14 = vmul.f32 127.0, %v1345_v13 }
 0x8e6   : > { %v949_v15 = vmul.f32 %v948_v14, %v941_v22 }
 0x8e8   : > { %v1243_v16 = vround.rtne.f32 %v949_v15 }
 0x8ea   : > { %v951_v17 = vmax.f32 %v1243_v16, -128.0 }
 0x8ec   : > { %v952_v18 = vmin.f32 %v951_v17, 127.0 }
 0x8ee   : > { %v954_v19 = vtrunc.f32 %v952_v18 }
 0x8f0   : > { %v955_v20 = vpack.c.f32.eXmY %v954_v19, %v954_v19, 312 }
 0x8f2   : > { %v959_v21 = vpack.c.b8 %v955_v20, %v955_v20 }
 0x8f4   : > { %v963_v23 = vunpack.c.l.s8.bf16 %v959_v21 }
 0x8f6   : > { %1232 = vmatmul.mubr.msk.bf16.vlgmr.msra.gmra.mrb[12].mxu1 %vm908_vm5, %v963_v23 }
 0x9c9   : > { %v1009_v24 = vpop.f32.mrb[12].mxu1 }
 0x9ca   : > { %v1244_v26 = vtrunc.f32 %v1009_v24  ;;  %v1233_v27 = vpop.f32.mrb[13].mxu1 }
 0x9cb   : > { %v1012_v29 = vpop.f32.mrb[14].mxu1 }
 0x9cc   : > { %v1245_v30 = vcvt.f32.s32 %v1244_v26  ;;  %v1234_v31 = vpop.f32.mrb[15].mxu1 }
 0x9ce   : > { %v1016_v33 = vcvt.s32.f32 %v1245_v30 }
 0x9d0   : > { %v1019_v34 = vmul.f32 %v1018_v32, %v1016_v33 }
 0x9d2   : > { %1020 = vst.msk [vmem:[%s360_s21] sm:$0xff] %vm385_vm0, %v1019_v34 }
 0x9d3   : > { %1374 = shalt.err (!%p1371_p3)
}
 0x9d4   : > { %s1375_s12 = scalar_lea.hbm %s1678_s23, 128  ;;  %s1379_s21 = scalar_lea.hbm %s1734_s8, 256 }
 0x9d5   : > { %p1376_p5 = scmp.ne.s32.totalorder %s1678_s23, %s1375_s12  ;;  %p1380_p9 = scmp.lt.u32.totalorder %s1678_s23, %s1734_s8 }
 0x9d6   : > { %p1381_p12 = scmp.lt.u32.totalorder %s1379_s21, %s1375_s12  ;;  %p1383_p11 = scmp.lt.u32.totalorder %s1375_s12, %s1678_s23 }
 0x9d7   : > { %p1377_p6 = pnand %p1376_p5, %p1538_p4 }
 0x9d8   : > { %p1382_p10 = por %p1381_p12, %p1380_p9 }
 0x9d9   : > { %p1378_p7 = pneg %p1377_p6 }
 0x9da   : > { %p1384_p13 = por %p1383_p11, %p1382_p10 }
 0x9dc   : > { %p1385_p0 = pnand %p1384_p13, %p1378_p7 }
 0x9de   : > { %1388 = shalt.err (!%p1385_p0)
}
 0x9df   : > { %1250 = dma.vmem_to_hbm [thread:$0]  (%p1538_p4), %s1680_s22, 128, %s1678_s23, %s1022_s24  }
 0x9e0 PF: > { %p1262_p1 = scmp.ge.s32.totalorder %s1443_s10, 2  ;;  %s1048_s25 = sand.u32 1, %s1423_s27  }
 0x9e1   : > { %s1049_s30 = scalar_lea.sflag [#allocation7], %s1048_s25 }
 0x9e2   : > { %p1257_p2 = pnand %p1262_p1, %p1545_p8 }
 0x9e4   : > { %1418 = dma.done.wait (!%p1257_p2), %s1049_s30, 128  }
 0x9e5   : > { %1420 = vsyncadd (!%p1257_p2), %s1049_s30, 4294967168  ;;  %s22_s10 = sadd.s32 1, %s1443_s10   ;;  %s1739_s27 = smov %s1427_s28 }
 0x9e6   : > { %p19_p3 = scmp.ge.s32.totalorder %s22_s10, 4   ;;  %s1740_s28 = smov %s1431_s29 }
 0x9e7   : > { %s1741_s29 = smov %s1551_s18  ;;  %s1742_s30 = smov %s1439_s9 }
 0x9e8   : > { %s1743_s9 = smov %s1745_s13  ;;  %21 = sbr.rel (!%p19_p3) target bundleno = 5 (0x5), region = 108 }
 0x9ef   :  { %1054 = vsyncpa [#allocation7], 1 }
 0x9f0   :  { %1056 = vsyncpa [#allocation7 + $0x1], 1 }
 0x9f1   :  { %1057 = vsyncpa [#allocation8], 1 }
 0x9f2   :  { %1059 = vsyncpa [#allocation8 + $0x1], 1 }

// kernel: tpu_custom_call.1
= control target key start
LH: loop header
LB: loop body
LE: loop exit
PB: predicated region body
PF: predicated region fallthrough
CT: control target
= control target key end

     0   :  { %13 = vsyncpa [#allocation8], 0  ;;  %s1743_s0 = inlined_call_operand.vmem [shape: f32[2,8,32], index: 0, kind: input, shape index: {}]   ;;  %s1744_s1 = inlined_call_operand.vmem [shape: f32[2,8,32], index: 1, kind: input, shape index: {}]   ;;  %s1745_s2 = inlined_call_operand.vmem [shape: bf16[32,16], index: 2, kind: input, shape index: {}]   ;;  %s1746_s3 = inlined_call_operand.vmem [shape: bf16[32,16], index: 3, kind: input, shape index: {}]   ;;  %s1747_s4 = inlined_call_operand.vmem [shape: bf16[32,16], index: 4, kind: input, shape index: {}]   ;;  %s1748_s5 = inlined_call_operand.vmem [shape: bf16[16,32], index: 5, kind: input, shape index: {}]   ;;  %s1749_s6 = inlined_call_operand.vmem [shape: f32[2,16], index: 6, kind: input, shape index: {}]   ;;  %s1750_s7 = inlined_call_operand.vmem [shape: f32[4], index: 7, kind: input, shape index: {}]   ;;  %s1751_s8 = inlined_call_operand.hbm [shape: f32[2,8,32], index: 8, kind: output, shape index: {}]  }
   0x1   :  { %14 = vsyncpa [#allocation7], 0 }
   0x2   :  { %16 = vsyncpa [#allocation7 + $0x1], 0  ;;  %s1509_s27 = smov 0   ;;  %s1511_s28 = smov 0  }
   0x3   :  { %s1513_s29 = smov 0   ;;  %s1515_s30 = smov 0  }
   0x4   :  { %s1517_s9 = smov 0   ;;  %s1519_s10 = smov 0  }
   0x5 LB: > { %s1143_s11 = sadd.s32 4294967295, %s1454_s10   ;;  %s1144_s12 = sadd.s32 4294967294, %s1454_s10   ;;  %s1454_s10 = sphi %s1519_s10, %s22_s10   ;;  %s1450_s9 = sphi %s1517_s9, %s1760_s9   ;;  %s1446_s30 = sphi %s1515_s30, %s1759_s30   ;;  %s1442_s29 = sphi %s1513_s29, %s1758_s29   ;;  %s1438_s28 = sphi %s1511_s28, %s1757_s28   ;;  %s1434_s27 = sphi %s1509_s27, %s1756_s27  }
   0x6   : > { %s41_s13 = sadd.s32 1, %s1450_s9  ;;  %s232_s14 = sadd.s32 1, %s1442_s29 }
   0x7   : > { %p43_p0 = scmp.ge.s32.totalorder %s41_s13, 2  ;;  %p242_p1 = scmp.ne.s32.totalorder %s1442_s29, %s1438_s28 }
   0x8   : > { %p243_p2 = scmp.eq.s32.totalorder %s1143_s11, 1  ;;  %p248_p3 = scmp.ne.s32.totalorder %s1438_s28, %s1434_s27 }
   0x9   : > { %s1762_s13 = smov (%p43_p0, %s41_s13), 0  ;;  %p249_p5 = scmp.eq.s32.totalorder %s1144_s12, 1 }
   0xa   : > { %p1549_p4 = por %p243_p2, %p242_p1  ;;  %s227_s16 = ssub.s32 %s1450_s9, %s1762_s13 }
   0xb   : > { %p1145_p6 = scmp.ge.s32.totalorder %s1454_s10, 1  ;;  %p230_p7 = scmp.eq.s32.totalorder %s227_s16, 0 }
   0xc   : > { %p1556_p8 = por %p249_p5, %p248_p3  ;;  %p256_p9 = scmp.lt.s32.totalorder %s1454_s10, 3 }
   0xd   : > { %s1562_s18 = scalar_select %p230_p7, %s1442_s29, %s232_s14  }
   0xe   : > { %p1564_p10 = pnand %p1145_p6, %p256_p9  ;;  %p1568_p11 = scmp.eq.s32.totalorder %s1143_s11, 0 }
   0xf   : > { %s284_s23 = sshll.u32 %s1750_s7, 4  ;;  %s285_s23 = int_to_ptr.vmem [resolvable:$true] %s284_s23 }
  0x10   : > { %p1256_p12 = pneg %p1564_p10  ;;  %s1357_s24 = scalar_lea.vmem %s285_s23, 16 }
  0x11   : > { %p1358_p0 = scmp.ne.s32.totalorder %s285_s23, %s1357_s24  ;;  %p1365_p5 = scmp.lt.s32.totalorder %s285_s23, %s285_s23 }
  0x12   : > { %p1257_p13 = pnand %p1568_p11, %p1256_p12  ;;  %p1366_p6 = scmp.lt.s32.totalorder %s1357_s24, %s1357_s24 }
  0x14   : > { %p1359_p1 = pneg %p1257_p13  ;;  %p1367_p7 = por %p1366_p6, %p1365_p5 }
  0x16   : > { %p1360_p2 = pnand %p1359_p1, %p1358_p0 }
  0x18   : > { %p1361_p3 = pneg %p1360_p2 }
  0x1a   : > { %p1368_p9 = pnand %p1367_p7, %p1361_p3 }
  0x1c   : > { %1371 = shalt.err (!%p1368_p9)
}
  0x1d   : > { %s1456_s25 = smov [#allocation6]   ;;  %317 = sbr.rel (%p1564_p10) target bundleno = 2504 (0x9c8), region = 52 }
  0x1e   : > { %1259 = dma.vmem_to_smem (!%p1257_p13), %s285_s23, 16, %s1456_s25, [#allocation8]  }
  0x24   : > { %1425 = dma.done.wait (%p1568_p11), [#allocation8], 16  }
  0x25   : > { %1427 = vsyncadd (%p1568_p11), [#allocation8], 4294967280 }
  0x26   : > { %323 = sfence }
  0x27   : > { %p361_p12 = scmp.lt.s32.totalorder %s1446_s30, 1  ;;  %vm385_vm0 = vcmask 261120   ;;  %v1324_v20 = vld [vmem:[%s1745_s2] sm:$0xff]   ;;  %v1457_v21 = vmov 0.0   ;;  %v1325_v22 = vld [vmem:[%s1745_s2 + $0x8] sm:$0xff]   ;;  %vm1458_vm1 = vmmov 0  }
  0x28   : > { %1193 = vmatprep.subr.bf16.mxu0 %v1457_v21  ;;  %1201 = vmatprep.subr.bf16.mxu1 %v1457_v21  ;;  %v1326_v23 = vld [vmem:[%s1746_s3] sm:$0xff]   ;;  %v1327_v24 = vld [vmem:[%s1746_s3 + $0x8] sm:$0xff]   ;;  %vm470_vm2 = vcmask 64512   ;;  %s376_s20 = sld [smem:[#allocation6]]  ;;  %s1153_s24 = sld [smem:[#allocation6 + $0x1]]  ;;  %vm714_vm3 = vcmask 1043456  }
  0x29   : > { %s362_s26 = scalar_select %p361_p12, %s1446_s30, 1  ;;  %1194 = vmatpush3.bf16.msra.mxu0 %v1324_v20  ;;  %1202 = vmatpush3.bf16.msra.mxu1 %v1326_v23  ;;  %v1328_v39 = vld [vmem:[%s1747_s4] sm:$0xff]   ;;  %v1329_v43 = vld [vmem:[%s1747_s4 + $0x8] sm:$0xff]   ;;  %483 = vst.msk [vmem:[#allocation5] sm:$0xff] %vm470_vm2, %v1457_v21  ;;  %484 = vst.msk [vmem:[#allocation5 + $0x8] sm:$0xff] %vm470_vm2, %v1457_v21  ;;  %vm478_vm4 = vcmask 7168  }
  0x2a   : > { %1195 = vmatprep.subr.bf16.mxu0 %v1457_v21  ;;  %1203 = vmatprep.subr.bf16.mxu1 %v1457_v21  ;;  %s1459_s25 = smov 120   ;;  %481 = vst.msk [vmem:[#allocation4] sm:$0xff] %vm478_vm4, %v1457_v21  ;;  %482 = vst.msk [vmem:[#allocation4 + $0x8] sm:$0xff] %vm478_vm4, %v1457_v21  ;;  %vm925_vm5 = vcmask 130048   ;;  %s1154_s21 = sld [smem:[#allocation6 + $0x3]] }
  0x2b   : > { %s1151_s11 = sshll.u32 %s362_s26, 3  ;;  %1197 = vmatprep.mubr.msk.bf16.mxu0 %vm1458_vm1, %v1457_v21  ;;  %1205 = vmatprep.mubr.msk.bf16.mxu1 %vm1458_vm1, %v1457_v21  ;;  %s1462_s26 = smov 8  }
  0x2c   : > { %s367_s16 = scalar_lea.vmem %s1743_s0, %s1151_s11  ;;  %s374_s19 = scalar_lea.vmem %s1744_s1, %s1151_s11 }
  0x2d   : > { %v383_v0 = vld [vmem:[%s367_s16] sm:$0xff]  ;;  %1196 = vmatpush3.bf16.msra.mxu0 %v1325_v22  ;;  %1204 = vmatpush3.bf16.msra.mxu1 %v1327_v24  ;;  %s358_s22 = sand.u32 1, %s1438_s28   ;;  %s1463_s14 = smov [#allocation9]  }
  0x2e   : > { %v485_v1 = vld [vmem:[%s374_s19] sm:$0xff]  ;;  %v384_v2 = vmul.f32 %v383_v0, %v383_v0  ;;  %1209 = vmatprep.subr.bf16.mxu0 %v1457_v21  ;;  %1217 = vmatprep.subr.bf16.mxu1 %v1457_v21  ;;  %s466_s23 = smul.f32 0.125, %s376_s20  ;;  %v568_v50 = vstv %s1153_s24  ;;  %s1150_s19 = sshll.u32 %s358_s22, 3 }
  0x2f   : > { %v486_v3 = vmul.f32 %v485_v1, %v485_v1  ;;  %s1171_s20 = sshll.u32 %s1446_s30, 7  ;;  %s1028_s30 = scalar_lea.sflag [#allocation7], %s358_s22 }
  0x30   : > { %v386_v4 = vsel %vm385_vm0, %v384_v2, 0.0  ;;  %v467_v46 = vstv %s466_s23  ;;  %s360_s23 = scalar_lea.vmem [#allocation9], %s1150_s19  ;;  %s1695_s11 = scalar_lea.hbm %s1751_s8, %s1171_s20 }
  0x31   : > { %387 = vadd.xlane.f32.xlu0 %v386_v4  ;;  %v488_v5 = vsel %vm385_vm0, %v486_v3, 0.0  ;;  %s1042_s24 = sshll.u32 %s360_s23, 4  ;;  %s1376_s16 = sshll.u32 %s1463_s14, 4  ;;  %s1697_s24 = int_to_ptr.vmem [resolvable:$true] %s1042_s24  ;;  %s1377_s16 = int_to_ptr.vmem [resolvable:$false] %s1376_s16 }
  0x32   : > { %s1372_s12 = scalar_lea.vmem %s1697_s24, 128  ;;  %p1379_p0 = scmp.lt.s32.totalorder %s1697_s24, %s1377_s16 }
  0x33   : > { %p1373_p10 = scmp.ne.s32.totalorder %s1697_s24, %s1372_s12 }
  0x35   : > { %489 = vadd.xlane.f32.xlu0 %v488_v5  ;;  %p1374_p11 = pnand %p1373_p10, %p1549_p4 }
  0x37   : > { %p1375_p13 = pneg %p1374_p11 }
  0xbe   : > { %v388_v6 = vpop.xlane.xlu0 %387 }
  0xbf   : > { %v390_v7 = vmul.f32 0.03125, %v388_v6 }
  0xc1   : > { %v391_v8 = vadd.f32 1e-06, %v390_v7 }
  0xc2   : > { %v490_v9 = vpop.xlane.xlu0 %489 }
  0xc3   : > { %1331 = vrsqrt.f32 %v391_v8  ;;  %v492_v10 = vmul.f32 0.03125, %v490_v9 }
  0xc5   : > { %v493_v11 = vadd.f32 1e-06, %v492_v10 }
  0xc7   : > { %1333 = vrsqrt.f32 %v493_v11 }
  0xcd   : > { %v1332_v12 = vpop.eup %1331 }
  0xce   : > { %v393_v13 = vmul.f32 %v1332_v12, %v383_v0 }
  0xd0   : > { %v394_v14 = vand.u32 2147483647, %v393_v13 }
  0xd1   : > { %v1334_v15 = vpop.eup %1333 }
  0xd2   : > { %v395_v16 = vsel %vm385_vm0, %v394_v14, -inf  ;;  %v495_v17 = vmul.f32 %v1334_v15, %v485_v1 }
  0xd3   : > { %396 = vmax.xlane.f32.xlu1 %v395_v16 }
  0xd4   : > { %v496_v18 = vand.u32 2147483647, %v495_v17 }
  0xd6   : > { %v497_v19 = vsel %vm385_vm0, %v496_v18, -inf }
  0xd7   : > { %498 = vmax.xlane.f32.xlu1 %v497_v19  ;;  %v1461_v19 = vmov 0  }
  0xd8   : > { %1322 = vset.pattern.permute.xlu0 %v1461_v19  ;;  %1323 = vset.pattern.permute.xlu1 %v1461_v19 }
 0x160   : > { %v397_v25 = vpop.xlane.xlu1 %396 }
 0x161   : > { %v398_v26 = vmax.f32 %v397_v25, 1e-05 }
 0x163   : > { %1335 = vrcp.f32 %v398_v26  ;;  %v405_v45 = vmul.f32 0.007874016, %v398_v26 }
 0x164   : > { %v499_v27 = vpop.xlane.xlu1 %498 }
 0x165   : > { %v500_v28 = vmax.f32 %v499_v27, 1e-05  ;;  %v468_v48 = vmul.f32 %v467_v46, %v405_v45 }
 0x167   : > { %1337 = vrcp.f32 %v500_v28  ;;  %v507_v47 = vmul.f32 0.007874016, %v500_v28 }
 0x169   : > { %v569_v55 = vmul.f32 %v568_v50, %v507_v47 }
 0x16d   : > { %v1336_v29 = vpop.eup %1335 }
 0x16e   : > { %v400_v30 = vmul.f32 127.0, %v1336_v29 }
 0x170   : > { %v401_v31 = vmul.f32 %v400_v30, %v393_v13  ;;  %v1460_v13 = vmov -inf  }
 0x171   : > { %v1338_v32 = vpop.eup %1337  ;;  %479 = vst.msk [vmem:[#allocation3] sm:$0xff] %vm478_vm4, %v1460_v13  ;;  %480 = vst.msk [vmem:[#allocation3 + $0x8] sm:$0xff] %vm478_vm4, %v1460_v13 }
 0x172   : > { %v1247_v33 = vround.rtne.f32 %v401_v31  ;;  %v502_v34 = vmul.f32 127.0, %v1338_v32 }
 0x174   : > { %v403_v35 = vmax.f32 %v1247_v33, -128.0  ;;  %v503_v36 = vmul.f32 %v502_v34, %v495_v17 }
 0x176   : > { %v1248_v37 = vround.rtne.f32 %v503_v36  ;;  %v404_v38 = vmin.f32 %v403_v35, 127.0 }
 0x178   : > { %v505_v40 = vmax.f32 %v1248_v37, -128.0  ;;  %v406_v41 = vpack.c.bf16 %v404_v38, %v404_v38  ;;  %v679_v26 = vld [vmem:[#allocation3] sm:$0xff]  ;;  %v814_v30 = vld [vmem:[#allocation3 + $0x8] sm:$0xff] }
 0x17a   : > { %1198 = vmatmul.mubr.msk.bf16.vlgmr.msra.gmra.mrb[0].mxu0 %vm385_vm0, %v406_v41  ;;  %v506_v42 = vmin.f32 %v505_v40, 127.0 }
 0x17b   : > { %1210 = vmatpush3.bf16.msra.mxu0 %v1328_v39  ;;  %1213 = vmatprep.mubr.msk.bf16.mxu0 %vm1458_vm1, %v1457_v21 }
 0x17c   : > { %v508_v44 = vpack.c.bf16 %v506_v42, %v506_v42  ;;  %1211 = vmatprep.subr.bf16.mxu0 %v1457_v21 }
 0x17e   : > { %1206 = vmatmul.mubr.msk.bf16.vlgmr.msra.gmra.mrb[0].mxu1 %vm385_vm0, %v508_v44 }
 0x17f   : > { %1212 = vmatpush3.bf16.msra.mxu0 %v1329_v43  ;;  %1219 = vmatprep.mubr.msk.bf16.mxu1 %vm1458_vm1, %v1457_v21 }
 0x180   : > { %1223 = vmatprep.subr.bf16.mxu0 %v1457_v21 }
 0x182   : > { %1214 = vmatmul.mubr.msk.bf16.vlgmr.msra.gmra.mrb[4].mxu0 %vm385_vm0, %v508_v44 }
 0x183   : > { %1225 = vmatprep.mubr.msk.bf16.mxu0 %vm1458_vm1, %v1457_v21 }
 0x24d   : > { %v460_v49 = vpop.f32.mrb[0].mxu0 }
 0x24e   : > { %v469_v51 = vmul.f32 %v468_v48, %v460_v49  ;;  %v1199_v52 = vpop.f32.mrb[1].mxu0 }
 0x24f   : > { %v463_v53 = vpop.f32.mrb[2].mxu0 }
 0x250   : > { %471 = vst.msk [vmem:[#allocation2] sm:$0xff] %vm470_vm2, %v469_v51  ;;  %473 = vrot.lane.b32.xlu0 %v469_v51, %s1459_s25  ;;  %v1200_v54 = vpop.f32.mrb[3].mxu0  ;;  %v695_v51 = vld [vmem:[#allocation4] sm:$0xff] }
 0x251   : > { %v562_v56 = vpop.f32.mrb[0].mxu1 }
 0x252   : > { %v570_v57 = vmul.f32 %v569_v55, %v562_v56  ;;  %v1207_v58 = vpop.f32.mrb[1].mxu1  ;;  %v703_v55 = vld [vmem:[#allocation5] sm:$0xff] }
 0x253   : > { %v565_v59 = vpop.f32.mrb[2].mxu1 }
 0x254   : > { %v630_v60 = vpack.c.bf16 %v570_v57, %v570_v57  ;;  %v1208_v61 = vpop.f32.mrb[3].mxu1 }
 0x255   : > { %v621_v62 = vpop.f32.mrb[4].mxu0 }
 0x256   : > { %v637_v63 = vsel %vm470_vm2, %v630_v60, 0  ;;  %v627_v0 = vmul.f32 %v621_v62, %v507_v47  ;;  %v1215_v1 = vpop.f32.mrb[5].mxu0  ;;  %765 = vrot.lane.b32.xlu1 %v630_v60, %s1459_s25 }
 0x257   : > { %v624_v2 = vpop.f32.mrb[6].mxu0  ;;  %1218 = vmatpush3.bf16.xpose.msra.mxu1 %v637_v63  ;;  %v628_v5 = vld [vmem:[#allocation2] sm:$0xff]  ;;  %v831_v63 = vld [vmem:[#allocation4 + $0x8] sm:$0xff] }
 0x258   : > { %v631_v3 = vpack.c.bf16 %v627_v0, %v627_v0  ;;  %v1216_v4 = vpop.f32.mrb[7].mxu0  ;;  %1229 = vmatprep.subr.bf16.mxu1 %v1457_v21  ;;  %v629_v7 = vpack.c.bf16 %v628_v5, %v628_v5 }
 0x25a   : > { %v716_v6 = vsel %vm714_vm3, %v631_v3, 0 }
 0x25b   : > { %1224 = vmatpush3.bf16.msra.mxu0 %v716_v6 }
 0x25c   : > { %1235 = vmatprep.subr.bf16.mxu0 %v1457_v21 }
 0x25e   : > { %1220 = vmatmul.mubr.msk.bf16.vlgmr.msra.gmra.mrb[4].mxu1 %vm470_vm2, %v629_v7  ;;  %v839_v7 = vld [vmem:[#allocation5 + $0x8] sm:$0xff] }
 0x25f   : > { %1231 = vmatprep.mubr.msk.bf16.mxu1 %vm1458_vm1, %v1457_v21 }
 0x2c2   : > { %v474_v8 = vpop.permute.xlu0 %473 }
 0x2c3   : > { %477 = vst.msk [vmem:[#allocation2 + $0x8] sm:$0xff] %vm470_vm2, %v474_v8 }
 0x2c8   : > { %v766_v9 = vpop.permute.xlu1 %765 }
 0x2c9   : > { %v771_v10 = vsel %vm470_vm2, %v766_v9, 0 }
 0x2ca   : > { %1230 = vmatpush3.bf16.xpose.msra.mxu1 %v771_v10  ;;  %v762_v11 = vld [vmem:[#allocation2 + $0x8] sm:$0xff] }
 0x2cb   : > { %1241 = vmatprep.subr.bf16.mxu1 %v1457_v21  ;;  %v763_v12 = vpack.c.bf16 %v762_v11, %v762_v11 }
 0x2d1   : > { %1232 = vmatmul.mubr.msk.bf16.vlgmr.msra.gmra.mrb[8].mxu1 %vm470_vm2, %v763_v12 }
 0x2d2   : > { %1243 = vmatprep.mubr.msk.bf16.mxu1 %vm1458_vm1, %v1457_v21 }
 0x331   : > { %v673_v14 = vpop.f32.mrb[4].mxu1 }
 0x332   : > { %v1221_v15 = vpop.f32.mrb[5].mxu1  ;;  %v680_v16 = vsel %vm470_vm2, %v673_v14, -inf }
 0x333   : > { %681 = vmax.xlane.f32.xlu1 %v680_v16  ;;  %v676_v17 = vpop.f32.mrb[6].mxu1 }
 0x334   : > { %v1222_v18 = vpop.f32.mrb[7].mxu1 }
 0x3a4   : > { %v807_v20 = vpop.f32.mrb[8].mxu1 }
 0x3a5   : > { %v1233_v22 = vpop.f32.mrb[9].mxu1  ;;  %v815_v23 = vsel %vm470_vm2, %v807_v20, -inf }
 0x3a6   : > { %816 = vmax.xlane.f32.xlu0 %v815_v23  ;;  %v810_v24 = vpop.f32.mrb[10].mxu1 }
 0x3a7   : > { %v1234_v25 = vpop.f32.mrb[11].mxu1 }
 0x3c0   : > { %v682_v27 = vpop.xlane.xlu1 %681 }
 0x3c1   : > { %v683_v28 = vmax.f32 %v679_v26, %v682_v27 }
 0x3c3   : > { %v684_v29 = vsub.f32 %v679_v26, %v683_v28  ;;  %760 = vst.msk [vmem:[#allocation3] sm:$0xff] %vm478_vm4, %v683_v28  ;;  %689 = vperm.xlu0 %1322, %v683_v28  }
 0x3c5   : > { %v685_v40 = vmul.f32 1.442695, %v684_v29 }
 0x433   : > { %v817_v31 = vpop.xlane.xlu0 %816 }
 0x434   : > { %v818_v32 = vmax.f32 %v814_v30, %v817_v31 }
 0x436   : > { %v819_v33 = vsub.f32 %v814_v30, %v818_v32  ;;  %898 = vst.msk [vmem:[#allocation3 + $0x8] sm:$0xff] %vm478_vm4, %v818_v32  ;;  %824 = vperm.xlu1 %1323, %v818_v32   ;;  %v941_v32 = vlaneseq }
 0x43a   : > { %848 = vrot.lane.b32.xlu1 %v631_v3, %s1459_s25 }
 0x442   : > { %v690_v34 = vpop.permute.xlu0 %689 }
 0x443   : > { %v692_v35 = vsub.f32 %v673_v14, %v690_v34  ;;  %v942_v34 = vshrl.u32 %v941_v32, 7 }
 0x445   : > { %v693_v36 = vmul.f32 1.442695, %v692_v35  ;;  %v943_v35 = vsub.s32 0, %v942_v34 }
 0x447   : > { %1339 = vpow2.f32 %v693_v36  ;;  %v940_v36 = vld [vmem:[%s1749_s6] sm:$0x3] }
 0x448   : > { %1341 = vpow2.f32 %v685_v40 }
 0x451   : > { %v1340_v37 = vpop.eup %1339 }
 0x452   : > { %v697_v38 = vsel %vm470_vm2, %v1340_v37, 0.0  ;;  %v710_v39 = vpack.c.bf16 %v1340_v37, %v1340_v37  ;;  %v1342_v41 = vpop.eup %1341  ;;  %v948_v37 = vsub.s32 1, %v942_v34 }
 0x453   : > { %698 = vadd.xlane.f32.xlu0 %v697_v38  ;;  %v696_v52 = vmul.f32 %v1342_v41, %v695_v51  ;;  %v944_v38 = vrot.slane %v940_v36, %v943_v35 }
 0x454   : > { %1226 = vmatmul.mubr.msk.bf16.vlgmr.msra.gmra.mrb[8].mxu0 %vm470_vm2, %v710_v39 }
 0x455   : > { %1237 = vmatprep.mubr.msk.bf16.mxu0 %vm1458_vm1, %v1457_v21  ;;  %v820_v21 = vmul.f32 1.442695, %v819_v33 }
 0x469   : > { %706 = vperm.xlu0 %1322, %v1342_v41   ;;  %v949_v41 = vrot.slane %v940_v36, %v948_v37 }
 0x4b5   : > { %v825_v42 = vpop.permute.xlu1 %824 }
 0x4b6   : > { %v827_v43 = vsub.f32 %v807_v20, %v825_v42 }
 0x4b8   : > { %v828_v44 = vmul.f32 1.442695, %v827_v43 }
 0x4b9   : > { %v849_v45 = vpop.permute.xlu1 %848 }
 0x4ba   : > { %1343 = vpow2.f32 %v828_v44  ;;  %v854_v46 = vsel %vm714_vm3, %v849_v45, 0 }
 0x4bb   : > { %1236 = vmatpush3.bf16.msra.mxu0 %v854_v46  ;;  %1345 = vpow2.f32 %v820_v21 }
 0x4c4   : > { %v1344_v47 = vpop.eup %1343 }
 0x4c5   : > { %v833_v48 = vsel %vm470_vm2, %v1344_v47, 0.0  ;;  %v846_v49 = vpack.c.bf16 %v1344_v47, %v1344_v47  ;;  %v1346_v50 = vpop.eup %1345 }
 0x4c6   : > { %834 = vadd.xlane.f32.xlu1 %v833_v48  ;;  %v832_v0 = vmul.f32 %v1346_v50, %v831_v63  ;;  %v1023_v63 = vstv %s1154_s21  ;;  %s1378_s21 = scalar_lea.vmem %s1377_s16, 256 }
 0x4c7   : > { %1238 = vmatmul.mubr.msk.bf16.vlgmr.msra.gmra.mrb[12].mxu0 %vm470_vm2, %v846_v49  ;;  %p1380_p1 = scmp.lt.s32.totalorder %s1378_s21, %s1372_s12 }
 0x4c9   : > { %p1381_p2 = por %p1380_p1, %p1379_p0 }
 0x4cb   : > { %p1382_p3 = pnand %p1381_p2, %p1375_p13 }
 0x4d7   : > { %842 = vperm.xlu1 %1323, %v1346_v50  }
 0x4e0   : > { %v699_v53 = vpop.xlane.xlu0 %698 }
 0x4e1   : > { %v700_v54 = vadd.f32 %v699_v53, %v696_v52  ;;  %v1330_v52 = vld [vmem:[%s1748_s5] sm:$0xff]  }
 0x4e2   : > { %1242 = vmatpush3.bf16.msra.mxu1 %v1330_v52 }
 0x4e3   : > { %702 = vst.msk [vmem:[#allocation4] sm:$0xff] %vm478_vm4, %v700_v54 }
 0x4e8   : > { %v707_v56 = vpop.permute.xlu0 %706 }
 0x4e9   : > { %v709_v57 = vmul.f32 %v707_v56, %v703_v55 }
 0x4ea   : > { %v903_v4 = vld [vmem:[#allocation4] sm:$0xff] }
 0x527   : > { %v752_v58 = vpop.f32.mrb[8].mxu0 }
 0x528   : > { %v758_v59 = vadd.f32 %v752_v58, %v709_v57  ;;  %v1227_v60 = vpop.f32.mrb[9].mxu0 }
 0x529   : > { %v755_v61 = vpop.f32.mrb[10].mxu0 }
 0x52a   : > { %759 = vst.msk [vmem:[#allocation5] sm:$0xff] %vm470_vm2, %v758_v59  ;;  %v1228_v62 = vpop.f32.mrb[11].mxu0 }
 0x531   : > { %v902_v19 = vld [vmem:[#allocation5] sm:$0xff] }
 0x553   : > { %v835_v1 = vpop.xlane.xlu1 %834 }
 0x554   : > { %v836_v2 = vadd.f32 %v835_v1, %v832_v0 }
 0x556   : > { %837 = vst.msk [vmem:[#allocation4 + $0x8] sm:$0xff] %vm478_vm4, %v836_v2 }
 0x557   : > { %v843_v8 = vpop.permute.xlu1 %842 }
 0x558   : > { %v845_v9 = vmul.f32 %v843_v8, %v839_v7 }
 0x55d   : > { %v912_v3 = vld [vmem:[#allocation4 + $0x8] sm:$0xff] }
 0x55e   : > { %1347 = vrcp.f32 %v912_v3 }
 0x55f   : > { %1349 = vrcp.f32 %v903_v4 }
 0x568   : > { %v1348_v5 = vpop.eup %1347 }
 0x569   : > { %916 = vperm.xlu1 %1323, %v1348_v5   ;;  %v1350_v6 = vpop.eup %1349 }
 0x56d   : > { %907 = vperm.xlu1 %1323, %v1350_v6  }
 0x59a   : > { %v890_v10 = vpop.f32.mrb[12].mxu0 }
 0x59b   : > { %v896_v11 = vadd.f32 %v890_v10, %v845_v9  ;;  %v1239_v12 = vpop.f32.mrb[13].mxu0 }
 0x59c   : > { %v893_v13 = vpop.f32.mrb[14].mxu0 }
 0x59d   : > { %897 = vst.msk [vmem:[#allocation5 + $0x8] sm:$0xff] %vm470_vm2, %v896_v11  ;;  %v1240_v14 = vpop.f32.mrb[15].mxu0 }
 0x5a4   : > { %v911_v16 = vld [vmem:[#allocation5 + $0x8] sm:$0xff] }
 0x5e8   : > { %v917_v15 = vpop.permute.xlu1 %916 }
 0x5e9   : > { %v919_v17 = vmul.f32 %v917_v15, %v911_v16 }
 0x5eb   : > { %921 = vrot.lane.b32.xlu1 %v919_v17, %s1462_s26 }
 0x5ec   : > { %v908_v18 = vpop.permute.xlu1 %907 }
 0x5ed   : > { %v910_v20 = vmul.f32 %v908_v18, %v902_v19 }
 0x65d   : > { %v922_v22 = vpop.permute.xlu1 %921 }
 0x65e   : > { %v924_v23 = vsel %vm470_vm2, %v910_v20, %v922_v22 }
 0x65f   : > { %v926_v24 = vsel %vm925_vm5, %v924_v23, 0.0 }
 0x660   : > { %927 = vadd.xlane.f32.xlu1 %v926_v24 }
 0x6ed   : > { %v928_v25 = vpop.xlane.xlu1 %927 }
 0x6ee   : > { %v930_v26 = vmul.f32 0.0625, %v928_v25 }
 0x6f0   : > { %v931_v27 = vsub.f32 %v924_v23, %v930_v26 }
 0x6f2   : > { %v932_v28 = vmul.f32 %v931_v27, %v931_v27 }
 0x6f4   : > { %v933_v29 = vsel %vm925_vm5, %v932_v28, 0.0 }
 0x6f5   : > { %934 = vadd.xlane.f32.xlu0 %v933_v29 }
 0x782   : > { %v935_v30 = vpop.xlane.xlu0 %934 }
 0x783   : > { %v936_v31 = vmul.f32 0.0625, %v935_v30 }
 0x785   : > { %v937_v33 = vadd.f32 1e-05, %v936_v31 }
 0x787   : > { %1351 = vrsqrt.f32 %v937_v33 }
 0x791   : > { %v1352_v39 = vpop.eup %1351 }
 0x792   : > { %v939_v40 = vmul.f32 %v1352_v39, %v931_v27 }
 0x794   : > { %v945_v42 = vmul.f32 %v944_v38, %v939_v40 }
 0x796   : > { %v950_v43 = vadd.f32 %v949_v41, %v945_v42 }
 0x798   : > { %v951_v44 = vmul.f32 %v950_v43, %v950_v43 }
 0x79a   : > { %v952_v45 = vsel %vm925_vm5, %v951_v44, 0.0 }
 0x79b   : > { %953 = vadd.xlane.f32.xlu1 %v952_v45 }
 0x828   : > { %v954_v46 = vpop.xlane.xlu1 %953 }
 0x829   : > { %v955_v47 = vmul.f32 0.0625, %v954_v46 }
 0x82b   : > { %v956_v48 = vadd.f32 1e-06, %v955_v47 }
 0x82d   : > { %1353 = vrsqrt.f32 %v956_v48 }
 0x837   : > { %v1354_v49 = vpop.eup %1353 }
 0x838   : > { %v958_v21 = vmul.f32 %v1354_v49, %v950_v43 }
 0x83a   : > { %v959_v50 = vand.u32 2147483647, %v958_v21 }
 0x83c   : > { %v960_v51 = vsel %vm925_vm5, %v959_v50, -inf }
 0x83d   : > { %961 = vmax.xlane.f32.xlu1 %v960_v51 }
 0x8ca   : > { %v962_v53 = vpop.xlane.xlu1 %961 }
 0x8cb   : > { %v963_v54 = vmax.f32 %v962_v53, 1e-05 }
 0x8cd   : > { %1355 = vrcp.f32 %v963_v54  ;;  %v970_v62 = vmul.f32 0.007874016, %v963_v54 }
 0x8cf   : > { %v1024_v0 = vmul.f32 %v1023_v63, %v970_v62 }
 0x8d7   : > { %v1356_v55 = vpop.eup %1355 }
 0x8d8   : > { %v965_v56 = vmul.f32 127.0, %v1356_v55 }
 0x8da   : > { %v966_v57 = vmul.f32 %v965_v56, %v958_v21 }
 0x8dc   : > { %v1249_v58 = vround.rtne.f32 %v966_v57 }
 0x8de   : > { %v968_v59 = vmax.f32 %v1249_v58, -128.0 }
 0x8e0   : > { %v969_v60 = vmin.f32 %v968_v59, 127.0 }
 0x8e2   : > { %v971_v61 = vpack.c.bf16 %v969_v60, %v969_v60 }
 0x8e4   : > { %1244 = vmatmul.mubr.msk.bf16.vlgmr.msra.gmra.mrb[12].mxu1 %vm925_vm5, %v971_v61 }
 0x9b7   : > { %v1017_v1 = vpop.f32.mrb[12].mxu1 }
 0x9b8   : > { %v1025_v2 = vmul.f32 %v1024_v0, %v1017_v1  ;;  %v1245_v3 = vpop.f32.mrb[13].mxu1 }
 0x9b9   : > { %v1020_v4 = vpop.f32.mrb[14].mxu1 }
 0x9ba   : > { %v1246_v5 = vpop.f32.mrb[15].mxu1  ;;  %1026 = vst.msk [vmem:[%s360_s23] sm:$0xff] %vm385_vm0, %v1025_v2 }
 0x9bb   : > { %1385 = shalt.err (!%p1382_p3)
}
 0x9bc   : > { %s1386_s22 = scalar_lea.hbm %s1695_s11, 128  ;;  %s1390_s23 = scalar_lea.hbm %s1751_s8, 256 }
 0x9bd   : > { %p1387_p5 = scmp.ne.s32.totalorder %s1695_s11, %s1386_s22  ;;  %p1391_p9 = scmp.lt.u32.totalorder %s1695_s11, %s1751_s8 }
 0x9be   : > { %p1392_p12 = scmp.lt.u32.totalorder %s1390_s23, %s1386_s22  ;;  %p1394_p11 = scmp.lt.u32.totalorder %s1386_s22, %s1695_s11 }
 0x9bf   : > { %p1388_p6 = pnand %p1387_p5, %p1549_p4 }
 0x9c0   : > { %p1393_p10 = por %p1392_p12, %p1391_p9 }
 0x9c1   : > { %p1389_p7 = pneg %p1388_p6 }
 0x9c2   : > { %p1395_p13 = por %p1394_p11, %p1393_p10 }
 0x9c4   : > { %p1396_p0 = pnand %p1395_p13, %p1389_p7 }
 0x9c6   : > { %1399 = shalt.err (!%p1396_p0)
}
 0x9c7   : > { %1254 = dma.vmem_to_hbm [thread:$0]  (%p1549_p4), %s1697_s24, 128, %s1695_s11, %s1028_s30  }
 0x9c8 PF: > { %p1266_p1 = scmp.ge.s32.totalorder %s1454_s10, 2  ;;  %s1054_s12 = sand.u32 1, %s1434_s27  }
 0x9c9   : > { %s1055_s14 = scalar_lea.sflag [#allocation7], %s1054_s12 }
 0x9ca   : > { %p1261_p2 = pnand %p1266_p1, %p1556_p8 }
 0x9cc   : > { %1429 = dma.done.wait (!%p1261_p2), %s1055_s14, 128  }
 0x9cd   : > { %1431 = vsyncadd (!%p1261_p2), %s1055_s14, 4294967168  ;;  %s22_s10 = sadd.s32 1, %s1454_s10   ;;  %s1756_s27 = smov %s1438_s28 }
 0x9ce   : > { %p19_p3 = scmp.ge.s32.totalorder %s22_s10, 4   ;;  %s1757_s28 = smov %s1442_s29 }
 0x9cf   : > { %s1758_s29 = smov %s1562_s18  ;;  %s1759_s30 = smov %s1450_s9 }
 0x9d0   : > { %s1760_s9 = smov %s1762_s13  ;;  %21 = sbr.rel (!%p19_p3) target bundleno = 5 (0x5), region = 108 }
 0x9d7   :  { %1060 = vsyncpa [#allocation7], 1 }
 0x9d8   :  { %1062 = vsyncpa [#allocation7 + $0x1], 1 }
 0x9d9   :  { %1063 = vsyncpa [#allocation8], 1 }
 0x9da   :  { %1065 = vsyncpa [#allocation8 + $0x1], 1 }

</bundles_post_ra>
